<compile_context>
chip_gen: v6e
topology: v6e:2x2x1
jax: 0.10.0
libtpu: 0.0.40
codegen_flags: <defaults>
</compile_context>

<pallas_src>
import functools

import jax
import jax.numpy as jnp
from jax.experimental import pallas as pl
from jax.experimental.pallas import tpu as pltpu


def _self_attention_kernel(q_ref, k_ref, v_ref,
                           wq_ref, wk_ref, wv_ref,
                           wo_ref, bo_ref,
                           o_ref,
                           slab_ref,
                           *, heads):
    """One grid step handles a block of B batch elements (all heads).

    Block shapes:
      q_ref/k_ref/v_ref : (B, L, E)   lane-dense view of the native layout
      wq/wk/wv          : (E, E)  block-diagonal (H copies of the DxD matrix),
                          already transposed (x @ w == torch Linear);
                          wq additionally carries the 1/sqrt(E) scale
      wo                : (E, E)  already transposed
      bo                : (1, E)  float32
      o_ref             : (B, L, E)
      slab_ref          : (B*L, E) f32 VMEM scratch (per-head output slab)
    """
    B, L, E = q_ref.shape
    H = heads
    D = E // H
    cdt = wq_ref.dtype  # matmul-operand ("compute") dtype: f32 or bf16

    # ---- Fused, lane-dense Q/K/V projections: one (B*L, E) @ (E, E) each. ----
    # Block-diagonal weights make this exactly the per-head Linear applied to
    # every head at once, with contraction depth K = E = 128.
    def project(x_ref, w_ref):
        x = x_ref[...].reshape(B * L, E).astype(cdt)   # major-dim collapse: free
        y = jnp.dot(x, w_ref[...], preferred_element_type=jnp.float32)
        return y.astype(cdt)                           # operand dtype for scores/PV

    qp = project(q_ref, wq_ref)   # 1/sqrt(E) scale already folded into wq
    kp = project(k_ref, wk_ref)
    vp = project(v_ref, wv_ref)

    # ---- Per-head attention: lane-slice heads out of the (B*L, E) layout. ----
    for h in range(H):                        # small static H -> unrolled
        lo, hi = h * D, (h + 1) * D           # static lane range
        qh = qp[:, lo:hi].reshape(B, L, D)
        kh = kp[:, lo:hi].reshape(B, L, D)
        vh = vp[:, lo:hi].reshape(B, L, D)

        # scores over the key axis; contraction over D, no k.T materialization
        s = jnp.einsum("bqd,bkd->bqk", qh, kh,
                       preferred_element_type=jnp.float32)      # (B, L, L) f32
        m = jnp.max(s, axis=-1, keepdims=True)
        p = jnp.exp(s - m)                                      # unnormalized f32
        l = jnp.sum(p, axis=-1, keepdims=True)

        o_h = jnp.einsum("bqk,bkd->bqd", p.astype(cdt), vh,
                         preferred_element_type=jnp.float32)    # (B, L, D) f32
        o_h = o_h * pl.reciprocal(l, approx=True)               # post-PV, EUP

        # write this head's output into its lane range of the f32 slab
        slab_ref[:, lo:hi] = o_h.reshape(B * L, D)

    # ---- Single K=E output projection + bias. ----
    out = jnp.dot(slab_ref[...].astype(cdt), wo_ref[...],
                  preferred_element_type=jnp.float32) + bo_ref[...]
    o_ref[...] = out.reshape(B, L, E).astype(o_ref.dtype)


def _preferred_compute_dtype():
    """bf16 matmul operands by default on v5e (its MXU has no native f32 path)."""
    try:
        kind = jax.devices()[0].device_kind.lower()
    except Exception:
        return jnp.float32
    if "v5 lite" in kind or "v5e" in kind or "v5lite" in kind:
        return jnp.bfloat16
    return jnp.float32


@functools.partial(jax.jit, static_argnames=("block_n", "compute_dtype"))
def _self_attention_pallas_impl(query, key, value, wq, wk, wv, wo, bo, *,
                                block_n, compute_dtype):
    N, L, H, D = query.shape
    E = H * D
    assert wq.shape == (D, D) and wk.shape == (D, D) and wv.shape == (D, D)
    assert wo.shape == (E, E) and bo.shape == (E,)

    # Grid with >= 2 steps by default: lets Pallas double-buffer the q/k/v DMA
    # stream and keeps both TensorCores busy on v7x.
    if block_n is None:
        bn = max(1, N // 8)
        while N % bn:
            bn -= 1
    else:
        bn = block_n
    assert N % bn == 0, "block_n must divide N"

    cdt = jnp.dtype(compute_dtype)
    scale = 1.0 / float(E) ** 0.5

    # Block-diagonal (E, E) weights: H copies of the per-head (D, D) matrix on
    # the diagonal, so x(B*L,E) @ W_bd == per-head x @ w.T for all heads at once.
    eye_h = jnp.eye(H, dtype=jnp.float32)
    wq_bd = jnp.kron(eye_h, wq.T.astype(jnp.float32) * scale).astype(cdt)  # scale folded in
    wk_bd = jnp.kron(eye_h, wk.T.astype(jnp.float32)).astype(cdt)
    wv_bd = jnp.kron(eye_h, wv.T.astype(jnp.float32)).astype(cdt)
    wo_t = wo.T.astype(cdt)
    bo2 = bo.reshape(1, E).astype(jnp.float32)

    # Free (bitcast) reshape to a lane-dense layout; q/k/v keep their input
    # dtype (no wrapper-side cast pass) -- the operand cast happens in-kernel.
    q = query.reshape(N, L, E)
    k = key.reshape(N, L, E)
    v = value.reshape(N, L, E)

    kernel = functools.partial(_self_attention_kernel, heads=H)

    grid_spec = pltpu.PrefetchScalarGridSpec(
        num_scalar_prefetch=0,
        grid=(N // bn,),
        in_specs=[
            pl.BlockSpec((bn, L, E), lambda i: (i, 0, 0)),   # q (lane-dense)
            pl.BlockSpec((bn, L, E), lambda i: (i, 0, 0)),   # k
            pl.BlockSpec((bn, L, E), lambda i: (i, 0, 0)),   # v
            pl.BlockSpec((E, E), lambda i: (0, 0)),          # wq^T block-diag * scale
            pl.BlockSpec((E, E), lambda i: (0, 0)),          # wk^T block-diag
            pl.BlockSpec((E, E), lambda i: (0, 0)),          # wv^T block-diag
            pl.BlockSpec((E, E), lambda i: (0, 0)),          # wo^T
            pl.BlockSpec((1, E), lambda i: (0, 0)),          # bo
        ],
        out_specs=pl.BlockSpec((bn, L, E), lambda i: (i, 0, 0)),
        scratch_shapes=[pltpu.VMEM((bn * L, E), jnp.float32)],  # per-head output slab
    )

    return pl.pallas_call(
        kernel,
        out_shape=jax.ShapeDtypeStruct((N, L, E), query.dtype),
        grid_spec=grid_spec,
        compiler_params=pltpu.CompilerParams(
            dimension_semantics=("parallel",),
            vmem_limit_bytes=64 * 1024 * 1024),
    )(q, k, v, wq_bd, wk_bd, wv_bd, wo_t, bo2)


def self_attention_pallas(query, key, value, wq, wk, wv, wo, bo, *,
                          block_n=None, compute_dtype=None):
    """query/key/value: (N, L, heads, head_dim).

    wq/wk/wv: (head_dim, head_dim)  PyTorch (out, in) convention
    wo:       (E, E)                PyTorch (out, in) convention
    bo:       (E,)
    compute_dtype: matmul-operand dtype (None -> auto: bf16 on v5e, else f32).
    Returns:  (N, L, E) in query.dtype
    """
    if compute_dtype is None:
        compute_dtype = _preferred_compute_dtype()
    return _self_attention_pallas_impl(query, key, value, wq, wk, wv, wo, bo,
                                       block_n=block_n,
                                       compute_dtype=jnp.dtype(compute_dtype))


def self_attention_reference(query, key, value, wq, wk, wv, wo, bo):
    """Pure-JAX mirror of the PyTorch forward (mask=None)."""
    N, L, H, D = query.shape
    E = H * D
    qp = jnp.einsum("nlhd,ed->nlhe", query, wq)   # x @ wq.T
    kp = jnp.einsum("nlhd,ed->nlhe", key, wk)
    vp = jnp.einsum("nlhd,ed->nlhe", value, wv)
    energy = jnp.einsum("nqhd,nkhd->nhqk", qp, kp)
    attention = jax.nn.softmax(energy / jnp.sqrt(jnp.float32(E)), axis=3)
    out = jnp.einsum("nhql,nlhd->nqhd", attention, vp).reshape(N, L, E)
    return out @ wo.T + bo


if __name__ == "__main__":
    # small shapes consistent with the module; E=128 keeps everything lane-dense
    N, L = 2, 8
    heads, head_dim = 8, 16
    embed_size = heads * head_dim  # 128

    key0 = jax.random.PRNGKey(0)
    kq, kk, kv, kwq, kwk, kwv, kwo, kbo = jax.random.split(key0, 8)

    query = jax.random.normal(kq, (N, L, heads, head_dim), dtype=jnp.float32)
    key_ = jax.random.normal(kk, (N, L, heads, head_dim), dtype=jnp.float32)
    value = jax.random.normal(kv, (N, L, heads, head_dim), dtype=jnp.float32)

    # deterministic parameter init (PyTorch Linear-style uniform bounds)
    b_hd = 1.0 / jnp.sqrt(jnp.float32(head_dim))
    b_e = 1.0 / jnp.sqrt(jnp.float32(embed_size))
    wq = jax.random.uniform(kwq, (head_dim, head_dim), jnp.float32, -b_hd, b_hd)
    wk = jax.random.uniform(kwk, (head_dim, head_dim), jnp.float32, -b_hd, b_hd)
    wv = jax.random.uniform(kwv, (head_dim, head_dim), jnp.float32, -b_hd, b_hd)
    wo = jax.random.uniform(kwo, (embed_size, embed_size), jnp.float32, -b_e, b_e)
    bo = jax.random.uniform(kbo, (embed_size,), jnp.float32, -b_e, b_e)

    ref = self_attention_reference(query, key_, value, wq, wk, wv, wo, bo)

    # f32 matmul-operand path (approx-reciprocal normalization -> slightly
    # looser than pure-f32 bitwise tolerance)
    out = self_attention_pallas(query, key_, value, wq, wk, wv, wo, bo,
                                compute_dtype=jnp.float32)
    out = jax.block_until_ready(out)
    assert out.shape == (N, L, embed_size)
    assert jnp.allclose(out, ref, atol=5e-3, rtol=5e-3), (
        f"f32 max abs err {jnp.max(jnp.abs(out - ref))}")

    # bf16 MXU-operand path (softmax/accumulation stay f32): looser tolerance
    out_bf16 = self_attention_pallas(query, key_, value, wq, wk, wv, wo, bo,
                                     compute_dtype=jnp.bfloat16)
    out_bf16 = jax.block_until_ready(out_bf16)
    assert out_bf16.shape == (N, L, embed_size)
    assert jnp.allclose(out_bf16, ref, atol=3e-2, rtol=3e-2), (
        f"bf16 max abs err {jnp.max(jnp.abs(out_bf16 - ref))}")

    print("KERNEL_OK")
</pallas_src>

<mosaic_0001>
module attributes {stable_mosaic.version = 11 : i64} {
  func.func @_self_attention_kernel(%arg0: i32, %arg1: memref<1x8x128xf32, #tpu.memory_space<vmem>>, %arg2: memref<1x8x128xf32, #tpu.memory_space<vmem>>, %arg3: memref<1x8x128xf32, #tpu.memory_space<vmem>>, %arg4: memref<128x128xf32, #tpu.memory_space<vmem>>, %arg5: memref<128x128xf32, #tpu.memory_space<vmem>>, %arg6: memref<128x128xf32, #tpu.memory_space<vmem>>, %arg7: memref<128x128xf32, #tpu.memory_space<vmem>>, %arg8: memref<1x128xf32, #tpu.memory_space<vmem>>, %arg9: memref<1x8x128xf32, #tpu.memory_space<vmem>>, %arg10: memref<8x128xf32, #tpu.memory_space<vmem>>) attributes {dimension_semantics = [#tpu.dimension_semantics<parallel>], iteration_bounds = array<i64: 2>, scalar_prefetch = 0 : i64, scratch_operands = 1 : i64, tpu.core_type = #tpu.core_type<tc>, window_params = [{transform_indices = @transform_0, window_bounds = array<i64: 1, 8, 128>}, {transform_indices = @transform_1, window_bounds = array<i64: 1, 8, 128>}, {transform_indices = @transform_2, window_bounds = array<i64: 1, 8, 128>}, {pipeline_mode = #tpu.pipeline_mode<synchronous>, transform_indices = @transform_3, window_bounds = array<i64: 128, 128>}, {pipeline_mode = #tpu.pipeline_mode<synchronous>, transform_indices = @transform_4, window_bounds = array<i64: 128, 128>}, {pipeline_mode = #tpu.pipeline_mode<synchronous>, transform_indices = @transform_5, window_bounds = array<i64: 128, 128>}, {pipeline_mode = #tpu.pipeline_mode<synchronous>, transform_indices = @transform_6, window_bounds = array<i64: 128, 128>}, {pipeline_mode = #tpu.pipeline_mode<synchronous>, transform_indices = @transform_7, window_bounds = array<i64: 1, 128>}, {transform_indices = @transform_8, window_bounds = array<i64: 1, 8, 128>}]} {
    %c0 = arith.constant 0 : index
    %c0_0 = arith.constant 0 : index
    %c0_1 = arith.constant 0 : index
    %0 = vector.load %arg1[%c0, %c0_0, %c0_1] : memref<1x8x128xf32, #tpu.memory_space<vmem>>, vector<1x8x128xf32>
    %1 = vector.shape_cast %0 : vector<1x8x128xf32> to vector<8x128xf32>
    %c0_2 = arith.constant 0 : index
    %c0_3 = arith.constant 0 : index
    %2 = vector.load %arg4[%c0_2, %c0_3] : memref<128x128xf32, #tpu.memory_space<vmem>>, vector<128x128xf32>
    %cst = arith.constant dense<0.000000e+00> : vector<8x128xf32>
    %3 = tpu.matmul %1, %2, %cst {dimension_numbers = #tpu.dot_dimension_numbers<[1], [0], [0], [1], [0, 0, 1, 1], [], []>} : vector<8x128xf32>, vector<128x128xf32>, vector<8x128xf32> -> vector<8x128xf32>
    %c0_4 = arith.constant 0 : index
    %c0_5 = arith.constant 0 : index
    %c0_6 = arith.constant 0 : index
    %4 = vector.load %arg2[%c0_4, %c0_5, %c0_6] : memref<1x8x128xf32, #tpu.memory_space<vmem>>, vector<1x8x128xf32>
    %5 = vector.shape_cast %4 : vector<1x8x128xf32> to vector<8x128xf32>
    %c0_7 = arith.constant 0 : index
    %c0_8 = arith.constant 0 : index
    %6 = vector.load %arg5[%c0_7, %c0_8] : memref<128x128xf32, #tpu.memory_space<vmem>>, vector<128x128xf32>
    %cst_9 = arith.constant dense<0.000000e+00> : vector<8x128xf32>
    %7 = tpu.matmul %5, %6, %cst_9 {dimension_numbers = #tpu.dot_dimension_numbers<[1], [0], [0], [1], [0, 0, 1, 1], [], []>} : vector<8x128xf32>, vector<128x128xf32>, vector<8x128xf32> -> vector<8x128xf32>
    %c0_10 = arith.constant 0 : index
    %c0_11 = arith.constant 0 : index
    %c0_12 = arith.constant 0 : index
    %8 = vector.load %arg3[%c0_10, %c0_11, %c0_12] : memref<1x8x128xf32, #tpu.memory_space<vmem>>, vector<1x8x128xf32>
    %9 = vector.shape_cast %8 : vector<1x8x128xf32> to vector<8x128xf32>
    %c0_13 = arith.constant 0 : index
    %c0_14 = arith.constant 0 : index
    %10 = vector.load %arg6[%c0_13, %c0_14] : memref<128x128xf32, #tpu.memory_space<vmem>>, vector<128x128xf32>
    %cst_15 = arith.constant dense<0.000000e+00> : vector<8x128xf32>
    %11 = tpu.matmul %9, %10, %cst_15 {dimension_numbers = #tpu.dot_dimension_numbers<[1], [0], [0], [1], [0, 0, 1, 1], [], []>} : vector<8x128xf32>, vector<128x128xf32>, vector<8x128xf32> -> vector<8x128xf32>
    %12 = vector.extract_strided_slice %3 {offsets = [0, 0], sizes = [8, 16], strides = [1, 1]} : vector<8x128xf32> to vector<8x16xf32>
    %13 = vector.shape_cast %12 : vector<8x16xf32> to vector<1x8x16xf32>
    %14 = vector.extract_strided_slice %7 {offsets = [0, 0], sizes = [8, 16], strides = [1, 1]} : vector<8x128xf32> to vector<8x16xf32>
    %15 = vector.shape_cast %14 : vector<8x16xf32> to vector<1x8x16xf32>
    %16 = vector.extract_strided_slice %11 {offsets = [0, 0], sizes = [8, 16], strides = [1, 1]} : vector<8x128xf32> to vector<8x16xf32>
    %17 = vector.shape_cast %16 : vector<8x16xf32> to vector<1x8x16xf32>
    "tpu.trace_start"() <{level = 10 : i32, message = "bqd,bkd->bqk"}> : () -> ()
    %cst_16 = arith.constant dense<0.000000e+00> : vector<1x8x8xf32>
    %18 = tpu.matmul %13, %15, %cst_16 {dimension_numbers = #tpu.dot_dimension_numbers<[2], [2], [1], [1], [0, 0, 0, 1, 1, 1], [0], [0]>} : vector<1x8x16xf32>, vector<1x8x16xf32>, vector<1x8x8xf32> -> vector<1x8x8xf32>
    "tpu.trace_stop"() : () -> ()
    %cst_17 = arith.constant dense<0xFF800000> : vector<1x8xf32>
    %19 = vector.multi_reduction <maximumf>, %18, %cst_17 [2] : vector<1x8x8xf32> to vector<1x8xf32>
    %20 = vector.shape_cast %19 : vector<1x8xf32> to vector<1x8x1xf32>
    %21 = vector.broadcast %20 : vector<1x8x1xf32> to vector<1x8x8xf32>
    %22 = arith.subf %18, %21 : vector<1x8x8xf32>
    %23 = math.exp %22 : vector<1x8x8xf32>
    %cst_18 = arith.constant dense<0.000000e+00> : vector<1x8xf32>
    %24 = vector.multi_reduction <add>, %23, %cst_18 [2] : vector<1x8x8xf32> to vector<1x8xf32>
    %25 = vector.shape_cast %24 : vector<1x8xf32> to vector<1x8x1xf32>
    "tpu.trace_start"() <{level = 10 : i32, message = "bqk,bkd->bqd"}> : () -> ()
    %cst_19 = arith.constant dense<0.000000e+00> : vector<1x8x16xf32>
    %26 = tpu.matmul %23, %17, %cst_19 {dimension_numbers = #tpu.dot_dimension_numbers<[2], [1], [1], [2], [0, 0, 0, 1, 1, 2], [0], [0]>} : vector<1x8x8xf32>, vector<1x8x16xf32>, vector<1x8x16xf32> -> vector<1x8x16xf32>
    "tpu.trace_stop"() : () -> ()
    %27 = tpu.reciprocal %25 {approx = true} : vector<1x8x1xf32> -> vector<1x8x1xf32>
    %28 = vector.broadcast %27 : vector<1x8x1xf32> to vector<1x8x16xf32>
    %29 = arith.mulf %26, %28 : vector<1x8x16xf32>
    %30 = vector.shape_cast %29 : vector<1x8x16xf32> to vector<8x16xf32>
    %c0_20 = arith.constant 0 : index
    %c0_21 = arith.constant 0 : index
    %31 = vector.load %arg10[%c0_20, %c0_21] : memref<8x128xf32, #tpu.memory_space<vmem>>, vector<8x16xf32>
    tpu.vector_store %arg10[%c0_20, %c0_21], %30 {strides = array<i32>} : memref<8x128xf32, #tpu.memory_space<vmem>>, vector<8x16xf32>,
    %32 = vector.extract_strided_slice %3 {offsets = [0, 16], sizes = [8, 16], strides = [1, 1]} : vector<8x128xf32> to vector<8x16xf32>
    %33 = vector.shape_cast %32 : vector<8x16xf32> to vector<1x8x16xf32>
    %34 = vector.extract_strided_slice %7 {offsets = [0, 16], sizes = [8, 16], strides = [1, 1]} : vector<8x128xf32> to vector<8x16xf32>
    %35 = vector.shape_cast %34 : vector<8x16xf32> to vector<1x8x16xf32>
    %36 = vector.extract_strided_slice %11 {offsets = [0, 16], sizes = [8, 16], strides = [1, 1]} : vector<8x128xf32> to vector<8x16xf32>
    %37 = vector.shape_cast %36 : vector<8x16xf32> to vector<1x8x16xf32>
    "tpu.trace_start"() <{level = 10 : i32, message = "bqd,bkd->bqk"}> : () -> ()
    %cst_22 = arith.constant dense<0.000000e+00> : vector<1x8x8xf32>
    %38 = tpu.matmul %33, %35, %cst_22 {dimension_numbers = #tpu.dot_dimension_numbers<[2], [2], [1], [1], [0, 0, 0, 1, 1, 1], [0], [0]>} : vector<1x8x16xf32>, vector<1x8x16xf32>, vector<1x8x8xf32> -> vector<1x8x8xf32>
    "tpu.trace_stop"() : () -> ()
    %cst_23 = arith.constant dense<0xFF800000> : vector<1x8xf32>
    %39 = vector.multi_reduction <maximumf>, %38, %cst_23 [2] : vector<1x8x8xf32> to vector<1x8xf32>
    %40 = vector.shape_cast %39 : vector<1x8xf32> to vector<1x8x1xf32>
    %41 = vector.broadcast %40 : vector<1x8x1xf32> to vector<1x8x8xf32>
    %42 = arith.subf %38, %41 : vector<1x8x8xf32>
    %43 = math.exp %42 : vector<1x8x8xf32>
    %cst_24 = arith.constant dense<0.000000e+00> : vector<1x8xf32>
    %44 = vector.multi_reduction <add>, %43, %cst_24 [2] : vector<1x8x8xf32> to vector<1x8xf32>
    %45 = vector.shape_cast %44 : vector<1x8xf32> to vector<1x8x1xf32>
    "tpu.trace_start"() <{level = 10 : i32, message = "bqk,bkd->bqd"}> : () -> ()
    %cst_25 = arith.constant dense<0.000000e+00> : vector<1x8x16xf32>
    %46 = tpu.matmul %43, %37, %cst_25 {dimension_numbers = #tpu.dot_dimension_numbers<[2], [1], [1], [2], [0, 0, 0, 1, 1, 2], [0], [0]>} : vector<1x8x8xf32>, vector<1x8x16xf32>, vector<1x8x16xf32> -> vector<1x8x16xf32>
    "tpu.trace_stop"() : () -> ()
    %47 = tpu.reciprocal %45 {approx = true} : vector<1x8x1xf32> -> vector<1x8x1xf32>
    %48 = vector.broadcast %47 : vector<1x8x1xf32> to vector<1x8x16xf32>
    %49 = arith.mulf %46, %48 : vector<1x8x16xf32>
    %50 = vector.shape_cast %49 : vector<1x8x16xf32> to vector<8x16xf32>
    %c0_26 = arith.constant 0 : index
    %c16 = arith.constant 16 : index
    %51 = vector.load %arg10[%c0_26, %c16] : memref<8x128xf32, #tpu.memory_space<vmem>>, vector<8x16xf32>
    tpu.vector_store %arg10[%c0_26, %c16], %50 {strides = array<i32>} : memref<8x128xf32, #tpu.memory_space<vmem>>, vector<8x16xf32>,
    %52 = vector.extract_strided_slice %3 {offsets = [0, 32], sizes = [8, 16], strides = [1, 1]} : vector<8x128xf32> to vector<8x16xf32>
    %53 = vector.shape_cast %52 : vector<8x16xf32> to vector<1x8x16xf32>
    %54 = vector.extract_strided_slice %7 {offsets = [0, 32], sizes = [8, 16], strides = [1, 1]} : vector<8x128xf32> to vector<8x16xf32>
    %55 = vector.shape_cast %54 : vector<8x16xf32> to vector<1x8x16xf32>
    %56 = vector.extract_strided_slice %11 {offsets = [0, 32], sizes = [8, 16], strides = [1, 1]} : vector<8x128xf32> to vector<8x16xf32>
    %57 = vector.shape_cast %56 : vector<8x16xf32> to vector<1x8x16xf32>
    "tpu.trace_start"() <{level = 10 : i32, message = "bqd,bkd->bqk"}> : () -> ()
    %cst_27 = arith.constant dense<0.000000e+00> : vector<1x8x8xf32>
    %58 = tpu.matmul %53, %55, %cst_27 {dimension_numbers = #tpu.dot_dimension_numbers<[2], [2], [1], [1], [0, 0, 0, 1, 1, 1], [0], [0]>} : vector<1x8x16xf32>, vector<1x8x16xf32>, vector<1x8x8xf32> -> vector<1x8x8xf32>
    "tpu.trace_stop"() : () -> ()
    %cst_28 = arith.constant dense<0xFF800000> : vector<1x8xf32>
    %59 = vector.multi_reduction <maximumf>, %58, %cst_28 [2] : vector<1x8x8xf32> to vector<1x8xf32>
    %60 = vector.shape_cast %59 : vector<1x8xf32> to vector<1x8x1xf32>
    %61 = vector.broadcast %60 : vector<1x8x1xf32> to vector<1x8x8xf32>
    %62 = arith.subf %58, %61 : vector<1x8x8xf32>
    %63 = math.exp %62 : vector<1x8x8xf32>
    %cst_29 = arith.constant dense<0.000000e+00> : vector<1x8xf32>
    %64 = vector.multi_reduction <add>, %63, %cst_29 [2] : vector<1x8x8xf32> to vector<1x8xf32>
    %65 = vector.shape_cast %64 : vector<1x8xf32> to vector<1x8x1xf32>
    "tpu.trace_start"() <{level = 10 : i32, message = "bqk,bkd->bqd"}> : () -> ()
    %cst_30 = arith.constant dense<0.000000e+00> : vector<1x8x16xf32>
    %66 = tpu.matmul %63, %57, %cst_30 {dimension_numbers = #tpu.dot_dimension_numbers<[2], [1], [1], [2], [0, 0, 0, 1, 1, 2], [0], [0]>} : vector<1x8x8xf32>, vector<1x8x16xf32>, vector<1x8x16xf32> -> vector<1x8x16xf32>
    "tpu.trace_stop"() : () -> ()
    %67 = tpu.reciprocal %65 {approx = true} : vector<1x8x1xf32> -> vector<1x8x1xf32>
    %68 = vector.broadcast %67 : vector<1x8x1xf32> to vector<1x8x16xf32>
    %69 = arith.mulf %66, %68 : vector<1x8x16xf32>
    %70 = vector.shape_cast %69 : vector<1x8x16xf32> to vector<8x16xf32>
    %c0_31 = arith.constant 0 : index
    %c32 = arith.constant 32 : index
    %71 = vector.load %arg10[%c0_31, %c32] : memref<8x128xf32, #tpu.memory_space<vmem>>, vector<8x16xf32>
    tpu.vector_store %arg10[%c0_31, %c32], %70 {strides = array<i32>} : memref<8x128xf32, #tpu.memory_space<vmem>>, vector<8x16xf32>,
    %72 = vector.extract_strided_slice %3 {offsets = [0, 48], sizes = [8, 16], strides = [1, 1]} : vector<8x128xf32> to vector<8x16xf32>
    %73 = vector.shape_cast %72 : vector<8x16xf32> to vector<1x8x16xf32>
    %74 = vector.extract_strided_slice %7 {offsets = [0, 48], sizes = [8, 16], strides = [1, 1]} : vector<8x128xf32> to vector<8x16xf32>
    %75 = vector.shape_cast %74 : vector<8x16xf32> to vector<1x8x16xf32>
    %76 = vector.extract_strided_slice %11 {offsets = [0, 48], sizes = [8, 16], strides = [1, 1]} : vector<8x128xf32> to vector<8x16xf32>
    %77 = vector.shape_cast %76 : vector<8x16xf32> to vector<1x8x16xf32>
    "tpu.trace_start"() <{level = 10 : i32, message = "bqd,bkd->bqk"}> : () -> ()
    %cst_32 = arith.constant dense<0.000000e+00> : vector<1x8x8xf32>
    %78 = tpu.matmul %73, %75, %cst_32 {dimension_numbers = #tpu.dot_dimension_numbers<[2], [2], [1], [1], [0, 0, 0, 1, 1, 1], [0], [0]>} : vector<1x8x16xf32>, vector<1x8x16xf32>, vector<1x8x8xf32> -> vector<1x8x8xf32>
    "tpu.trace_stop"() : () -> ()
    %cst_33 = arith.constant dense<0xFF800000> : vector<1x8xf32>
    %79 = vector.multi_reduction <maximumf>, %78, %cst_33 [2] : vector<1x8x8xf32> to vector<1x8xf32>
    %80 = vector.shape_cast %79 : vector<1x8xf32> to vector<1x8x1xf32>
    %81 = vector.broadcast %80 : vector<1x8x1xf32> to vector<1x8x8xf32>
    %82 = arith.subf %78, %81 : vector<1x8x8xf32>
    %83 = math.exp %82 : vector<1x8x8xf32>
    %cst_34 = arith.constant dense<0.000000e+00> : vector<1x8xf32>
    %84 = vector.multi_reduction <add>, %83, %cst_34 [2] : vector<1x8x8xf32> to vector<1x8xf32>
    %85 = vector.shape_cast %84 : vector<1x8xf32> to vector<1x8x1xf32>
    "tpu.trace_start"() <{level = 10 : i32, message = "bqk,bkd->bqd"}> : () -> ()
    %cst_35 = arith.constant dense<0.000000e+00> : vector<1x8x16xf32>
    %86 = tpu.matmul %83, %77, %cst_35 {dimension_numbers = #tpu.dot_dimension_numbers<[2], [1], [1], [2], [0, 0, 0, 1, 1, 2], [0], [0]>} : vector<1x8x8xf32>, vector<1x8x16xf32>, vector<1x8x16xf32> -> vector<1x8x16xf32>
    "tpu.trace_stop"() : () -> ()
    %87 = tpu.reciprocal %85 {approx = true} : vector<1x8x1xf32> -> vector<1x8x1xf32>
    %88 = vector.broadcast %87 : vector<1x8x1xf32> to vector<1x8x16xf32>
    %89 = arith.mulf %86, %88 : vector<1x8x16xf32>
    %90 = vector.shape_cast %89 : vector<1x8x16xf32> to vector<8x16xf32>
    %c0_36 = arith.constant 0 : index
    %c48 = arith.constant 48 : index
    %91 = vector.load %arg10[%c0_36, %c48] : memref<8x128xf32, #tpu.memory_space<vmem>>, vector<8x16xf32>
    tpu.vector_store %arg10[%c0_36, %c48], %90 {strides = array<i32>} : memref<8x128xf32, #tpu.memory_space<vmem>>, vector<8x16xf32>,
    %92 = vector.extract_strided_slice %3 {offsets = [0, 64], sizes = [8, 16], strides = [1, 1]} : vector<8x128xf32> to vector<8x16xf32>
    %93 = vector.shape_cast %92 : vector<8x16xf32> to vector<1x8x16xf32>
    %94 = vector.extract_strided_slice %7 {offsets = [0, 64], sizes = [8, 16], strides = [1, 1]} : vector<8x128xf32> to vector<8x16xf32>
    %95 = vector.shape_cast %94 : vector<8x16xf32> to vector<1x8x16xf32>
    %96 = vector.extract_strided_slice %11 {offsets = [0, 64], sizes = [8, 16], strides = [1, 1]} : vector<8x128xf32> to vector<8x16xf32>
    %97 = vector.shape_cast %96 : vector<8x16xf32> to vector<1x8x16xf32>
    "tpu.trace_start"() <{level = 10 : i32, message = "bqd,bkd->bqk"}> : () -> ()
    %cst_37 = arith.constant dense<0.000000e+00> : vector<1x8x8xf32>
    %98 = tpu.matmul %93, %95, %cst_37 {dimension_numbers = #tpu.dot_dimension_numbers<[2], [2], [1], [1], [0, 0, 0, 1, 1, 1], [0], [0]>} : vector<1x8x16xf32>, vector<1x8x16xf32>, vector<1x8x8xf32> -> vector<1x8x8xf32>
    "tpu.trace_stop"() : () -> ()
    %cst_38 = arith.constant dense<0xFF800000> : vector<1x8xf32>
    %99 = vector.multi_reduction <maximumf>, %98, %cst_38 [2] : vector<1x8x8xf32> to vector<1x8xf32>
    %100 = vector.shape_cast %99 : vector<1x8xf32> to vector<1x8x1xf32>
    %101 = vector.broadcast %100 : vector<1x8x1xf32> to vector<1x8x8xf32>
    %102 = arith.subf %98, %101 : vector<1x8x8xf32>
    %103 = math.exp %102 : vector<1x8x8xf32>
    %cst_39 = arith.constant dense<0.000000e+00> : vector<1x8xf32>
    %104 = vector.multi_reduction <add>, %103, %cst_39 [2] : vector<1x8x8xf32> to vector<1x8xf32>
    %105 = vector.shape_cast %104 : vector<1x8xf32> to vector<1x8x1xf32>
    "tpu.trace_start"() <{level = 10 : i32, message = "bqk,bkd->bqd"}> : () -> ()
    %cst_40 = arith.constant dense<0.000000e+00> : vector<1x8x16xf32>
    %106 = tpu.matmul %103, %97, %cst_40 {dimension_numbers = #tpu.dot_dimension_numbers<[2], [1], [1], [2], [0, 0, 0, 1, 1, 2], [0], [0]>} : vector<1x8x8xf32>, vector<1x8x16xf32>, vector<1x8x16xf32> -> vector<1x8x16xf32>
    "tpu.trace_stop"() : () -> ()
    %107 = tpu.reciprocal %105 {approx = true} : vector<1x8x1xf32> -> vector<1x8x1xf32>
    %108 = vector.broadcast %107 : vector<1x8x1xf32> to vector<1x8x16xf32>
    %109 = arith.mulf %106, %108 : vector<1x8x16xf32>
    %110 = vector.shape_cast %109 : vector<1x8x16xf32> to vector<8x16xf32>
    %c0_41 = arith.constant 0 : index
    %c64 = arith.constant 64 : index
    %111 = vector.load %arg10[%c0_41, %c64] : memref<8x128xf32, #tpu.memory_space<vmem>>, vector<8x16xf32>
    tpu.vector_store %arg10[%c0_41, %c64], %110 {strides = array<i32>} : memref<8x128xf32, #tpu.memory_space<vmem>>, vector<8x16xf32>,
    %112 = vector.extract_strided_slice %3 {offsets = [0, 80], sizes = [8, 16], strides = [1, 1]} : vector<8x128xf32> to vector<8x16xf32>
    %113 = vector.shape_cast %112 : vector<8x16xf32> to vector<1x8x16xf32>
    %114 = vector.extract_strided_slice %7 {offsets = [0, 80], sizes = [8, 16], strides = [1, 1]} : vector<8x128xf32> to vector<8x16xf32>
    %115 = vector.shape_cast %114 : vector<8x16xf32> to vector<1x8x16xf32>
    %116 = vector.extract_strided_slice %11 {offsets = [0, 80], sizes = [8, 16], strides = [1, 1]} : vector<8x128xf32> to vector<8x16xf32>
    %117 = vector.shape_cast %116 : vector<8x16xf32> to vector<1x8x16xf32>
    "tpu.trace_start"() <{level = 10 : i32, message = "bqd,bkd->bqk"}> : () -> ()
    %cst_42 = arith.constant dense<0.000000e+00> : vector<1x8x8xf32>
    %118 = tpu.matmul %113, %115, %cst_42 {dimension_numbers = #tpu.dot_dimension_numbers<[2], [2], [1], [1], [0, 0, 0, 1, 1, 1], [0], [0]>} : vector<1x8x16xf32>, vector<1x8x16xf32>, vector<1x8x8xf32> -> vector<1x8x8xf32>
    "tpu.trace_stop"() : () -> ()
    %cst_43 = arith.constant dense<0xFF800000> : vector<1x8xf32>
    %119 = vector.multi_reduction <maximumf>, %118, %cst_43 [2] : vector<1x8x8xf32> to vector<1x8xf32>
    %120 = vector.shape_cast %119 : vector<1x8xf32> to vector<1x8x1xf32>
    %121 = vector.broadcast %120 : vector<1x8x1xf32> to vector<1x8x8xf32>
    %122 = arith.subf %118, %121 : vector<1x8x8xf32>
    %123 = math.exp %122 : vector<1x8x8xf32>
    %cst_44 = arith.constant dense<0.000000e+00> : vector<1x8xf32>
    %124 = vector.multi_reduction <add>, %123, %cst_44 [2] : vector<1x8x8xf32> to vector<1x8xf32>
    %125 = vector.shape_cast %124 : vector<1x8xf32> to vector<1x8x1xf32>
    "tpu.trace_start"() <{level = 10 : i32, message = "bqk,bkd->bqd"}> : () -> ()
    %cst_45 = arith.constant dense<0.000000e+00> : vector<1x8x16xf32>
    %126 = tpu.matmul %123, %117, %cst_45 {dimension_numbers = #tpu.dot_dimension_numbers<[2], [1], [1], [2], [0, 0, 0, 1, 1, 2], [0], [0]>} : vector<1x8x8xf32>, vector<1x8x16xf32>, vector<1x8x16xf32> -> vector<1x8x16xf32>
    "tpu.trace_stop"() : () -> ()
    %127 = tpu.reciprocal %125 {approx = true} : vector<1x8x1xf32> -> vector<1x8x1xf32>
    %128 = vector.broadcast %127 : vector<1x8x1xf32> to vector<1x8x16xf32>
    %129 = arith.mulf %126, %128 : vector<1x8x16xf32>
    %130 = vector.shape_cast %129 : vector<1x8x16xf32> to vector<8x16xf32>
    %c0_46 = arith.constant 0 : index
    %c80 = arith.constant 80 : index
    %131 = vector.load %arg10[%c0_46, %c80] : memref<8x128xf32, #tpu.memory_space<vmem>>, vector<8x16xf32>
    tpu.vector_store %arg10[%c0_46, %c80], %130 {strides = array<i32>} : memref<8x128xf32, #tpu.memory_space<vmem>>, vector<8x16xf32>,
    %132 = vector.extract_strided_slice %3 {offsets = [0, 96], sizes = [8, 16], strides = [1, 1]} : vector<8x128xf32> to vector<8x16xf32>
    %133 = vector.shape_cast %132 : vector<8x16xf32> to vector<1x8x16xf32>
    %134 = vector.extract_strided_slice %7 {offsets = [0, 96], sizes = [8, 16], strides = [1, 1]} : vector<8x128xf32> to vector<8x16xf32>
    %135 = vector.shape_cast %134 : vector<8x16xf32> to vector<1x8x16xf32>
    %136 = vector.extract_strided_slice %11 {offsets = [0, 96], sizes = [8, 16], strides = [1, 1]} : vector<8x128xf32> to vector<8x16xf32>
    %137 = vector.shape_cast %136 : vector<8x16xf32> to vector<1x8x16xf32>
    "tpu.trace_start"() <{level = 10 : i32, message = "bqd,bkd->bqk"}> : () -> ()
    %cst_47 = arith.constant dense<0.000000e+00> : vector<1x8x8xf32>
    %138 = tpu.matmul %133, %135, %cst_47 {dimension_numbers = #tpu.dot_dimension_numbers<[2], [2], [1], [1], [0, 0, 0, 1, 1, 1], [0], [0]>} : vector<1x8x16xf32>, vector<1x8x16xf32>, vector<1x8x8xf32> -> vector<1x8x8xf32>
    "tpu.trace_stop"() : () -> ()
    %cst_48 = arith.constant dense<0xFF800000> : vector<1x8xf32>
    %139 = vector.multi_reduction <maximumf>, %138, %cst_48 [2] : vector<1x8x8xf32> to vector<1x8xf32>
    %140 = vector.shape_cast %139 : vector<1x8xf32> to vector<1x8x1xf32>
    %141 = vector.broadcast %140 : vector<1x8x1xf32> to vector<1x8x8xf32>
    %142 = arith.subf %138, %141 : vector<1x8x8xf32>
    %143 = math.exp %142 : vector<1x8x8xf32>
    %cst_49 = arith.constant dense<0.000000e+00> : vector<1x8xf32>
    %144 = vector.multi_reduction <add>, %143, %cst_49 [2] : vector<1x8x8xf32> to vector<1x8xf32>
    %145 = vector.shape_cast %144 : vector<1x8xf32> to vector<1x8x1xf32>
    "tpu.trace_start"() <{level = 10 : i32, message = "bqk,bkd->bqd"}> : () -> ()
    %cst_50 = arith.constant dense<0.000000e+00> : vector<1x8x16xf32>
    %146 = tpu.matmul %143, %137, %cst_50 {dimension_numbers = #tpu.dot_dimension_numbers<[2], [1], [1], [2], [0, 0, 0, 1, 1, 2], [0], [0]>} : vector<1x8x8xf32>, vector<1x8x16xf32>, vector<1x8x16xf32> -> vector<1x8x16xf32>
    "tpu.trace_stop"() : () -> ()
    %147 = tpu.reciprocal %145 {approx = true} : vector<1x8x1xf32> -> vector<1x8x1xf32>
    %148 = vector.broadcast %147 : vector<1x8x1xf32> to vector<1x8x16xf32>
    %149 = arith.mulf %146, %148 : vector<1x8x16xf32>
    %150 = vector.shape_cast %149 : vector<1x8x16xf32> to vector<8x16xf32>
    %c0_51 = arith.constant 0 : index
    %c96 = arith.constant 96 : index
    %151 = vector.load %arg10[%c0_51, %c96] : memref<8x128xf32, #tpu.memory_space<vmem>>, vector<8x16xf32>
    tpu.vector_store %arg10[%c0_51, %c96], %150 {strides = array<i32>} : memref<8x128xf32, #tpu.memory_space<vmem>>, vector<8x16xf32>,
    %152 = vector.extract_strided_slice %3 {offsets = [0, 112], sizes = [8, 16], strides = [1, 1]} : vector<8x128xf32> to vector<8x16xf32>
    %153 = vector.shape_cast %152 : vector<8x16xf32> to vector<1x8x16xf32>
    %154 = vector.extract_strided_slice %7 {offsets = [0, 112], sizes = [8, 16], strides = [1, 1]} : vector<8x128xf32> to vector<8x16xf32>
    %155 = vector.shape_cast %154 : vector<8x16xf32> to vector<1x8x16xf32>
    %156 = vector.extract_strided_slice %11 {offsets = [0, 112], sizes = [8, 16], strides = [1, 1]} : vector<8x128xf32> to vector<8x16xf32>
    %157 = vector.shape_cast %156 : vector<8x16xf32> to vector<1x8x16xf32>
    "tpu.trace_start"() <{level = 10 : i32, message = "bqd,bkd->bqk"}> : () -> ()
    %cst_52 = arith.constant dense<0.000000e+00> : vector<1x8x8xf32>
    %158 = tpu.matmul %153, %155, %cst_52 {dimension_numbers = #tpu.dot_dimension_numbers<[2], [2], [1], [1], [0, 0, 0, 1, 1, 1], [0], [0]>} : vector<1x8x16xf32>, vector<1x8x16xf32>, vector<1x8x8xf32> -> vector<1x8x8xf32>
    "tpu.trace_stop"() : () -> ()
    %cst_53 = arith.constant dense<0xFF800000> : vector<1x8xf32>
    %159 = vector.multi_reduction <maximumf>, %158, %cst_53 [2] : vector<1x8x8xf32> to vector<1x8xf32>
    %160 = vector.shape_cast %159 : vector<1x8xf32> to vector<1x8x1xf32>
    %161 = vector.broadcast %160 : vector<1x8x1xf32> to vector<1x8x8xf32>
    %162 = arith.subf %158, %161 : vector<1x8x8xf32>
    %163 = math.exp %162 : vector<1x8x8xf32>
    %cst_54 = arith.constant dense<0.000000e+00> : vector<1x8xf32>
    %164 = vector.multi_reduction <add>, %163, %cst_54 [2] : vector<1x8x8xf32> to vector<1x8xf32>
    %165 = vector.shape_cast %164 : vector<1x8xf32> to vector<1x8x1xf32>
    "tpu.trace_start"() <{level = 10 : i32, message = "bqk,bkd->bqd"}> : () -> ()
    %cst_55 = arith.constant dense<0.000000e+00> : vector<1x8x16xf32>
    %166 = tpu.matmul %163, %157, %cst_55 {dimension_numbers = #tpu.dot_dimension_numbers<[2], [1], [1], [2], [0, 0, 0, 1, 1, 2], [0], [0]>} : vector<1x8x8xf32>, vector<1x8x16xf32>, vector<1x8x16xf32> -> vector<1x8x16xf32>
    "tpu.trace_stop"() : () -> ()
    %167 = tpu.reciprocal %165 {approx = true} : vector<1x8x1xf32> -> vector<1x8x1xf32>
    %168 = vector.broadcast %167 : vector<1x8x1xf32> to vector<1x8x16xf32>
    %169 = arith.mulf %166, %168 : vector<1x8x16xf32>
    %170 = vector.shape_cast %169 : vector<1x8x16xf32> to vector<8x16xf32>
    %c0_56 = arith.constant 0 : index
    %c112 = arith.constant 112 : index
    %171 = vector.load %arg10[%c0_56, %c112] : memref<8x128xf32, #tpu.memory_space<vmem>>, vector<8x16xf32>
    tpu.vector_store %arg10[%c0_56, %c112], %170 {strides = array<i32>} : memref<8x128xf32, #tpu.memory_space<vmem>>, vector<8x16xf32>,
    %c0_57 = arith.constant 0 : index
    %c0_58 = arith.constant 0 : index
    %172 = vector.load %arg10[%c0_57, %c0_58] : memref<8x128xf32, #tpu.memory_space<vmem>>, vector<8x128xf32>
    %c0_59 = arith.constant 0 : index
    %c0_60 = arith.constant 0 : index
    %173 = vector.load %arg7[%c0_59, %c0_60] : memref<128x128xf32, #tpu.memory_space<vmem>>, vector<128x128xf32>
    %cst_61 = arith.constant dense<0.000000e+00> : vector<8x128xf32>
    %174 = tpu.matmul %172, %173, %cst_61 {dimension_numbers = #tpu.dot_dimension_numbers<[1], [0], [0], [1], [0, 0, 1, 1], [], []>} : vector<8x128xf32>, vector<128x128xf32>, vector<8x128xf32> -> vector<8x128xf32>
    %c0_62 = arith.constant 0 : index
    %c0_63 = arith.constant 0 : index
    %175 = vector.load %arg8[%c0_62, %c0_63] : memref<1x128xf32, #tpu.memory_space<vmem>>, vector<1x128xf32>
    %176 = vector.broadcast %175 : vector<1x128xf32> to vector<8x128xf32>
    %177 = arith.addf %174, %176 : vector<8x128xf32>
    %178 = vector.shape_cast %177 : vector<8x128xf32> to vector<1x8x128xf32>
    %c0_64 = arith.constant 0 : index
    %c0_65 = arith.constant 0 : index
    %c0_66 = arith.constant 0 : index
    %179 = vector.load %arg9[%c0_64, %c0_65, %c0_66] : memref<1x8x128xf32, #tpu.memory_space<vmem>>, vector<1x8x128xf32>
    tpu.vector_store %arg9[%c0_64, %c0_65, %c0_66], %178 {strides = array<i32>} : memref<1x8x128xf32, #tpu.memory_space<vmem>>, vector<1x8x128xf32>,
    return
  }
  func.func @transform_0(%arg0: i32) -> (i32, i32, i32) {
    %c0_i32 = arith.constant 0 : i32
    %c0_i32_0 = arith.constant 0 : i32
    %c0_i32_1 = arith.constant 0 : i32
    return %arg0, %c0_i32, %c0_i32_0 : i32, i32, i32
  }
  func.func @transform_1(%arg0: i32) -> (i32, i32, i32) {
    %c0_i32 = arith.constant 0 : i32
    %c0_i32_0 = arith.constant 0 : i32
    %c0_i32_1 = arith.constant 0 : i32
    return %arg0, %c0_i32, %c0_i32_0 : i32, i32, i32
  }
  func.func @transform_2(%arg0: i32) -> (i32, i32, i32) {
    %c0_i32 = arith.constant 0 : i32
    %c0_i32_0 = arith.constant 0 : i32
    %c0_i32_1 = arith.constant 0 : i32
    return %arg0, %c0_i32, %c0_i32_0 : i32, i32, i32
  }
  func.func @transform_3(%arg0: i32) -> (i32, i32) {
    %c0_i32 = arith.constant 0 : i32
    %c0_i32_0 = arith.constant 0 : i32
    %c0_i32_1 = arith.constant 0 : i32
    return %c0_i32, %c0_i32_0 : i32, i32
  }
  func.func @transform_4(%arg0: i32) -> (i32, i32) {
    %c0_i32 = arith.constant 0 : i32
    %c0_i32_0 = arith.constant 0 : i32
    %c0_i32_1 = arith.constant 0 : i32
    return %c0_i32, %c0_i32_0 : i32, i32
  }
  func.func @transform_5(%arg0: i32) -> (i32, i32) {
    %c0_i32 = arith.constant 0 : i32
    %c0_i32_0 = arith.constant 0 : i32
    %c0_i32_1 = arith.constant 0 : i32
    return %c0_i32, %c0_i32_0 : i32, i32
  }
  func.func @transform_6(%arg0: i32) -> (i32, i32) {
    %c0_i32 = arith.constant 0 : i32
    %c0_i32_0 = arith.constant 0 : i32
    %c0_i32_1 = arith.constant 0 : i32
    return %c0_i32, %c0_i32_0 : i32, i32
  }
  func.func @transform_7(%arg0: i32) -> (i32, i32) {
    %c0_i32 = arith.constant 0 : i32
    %c0_i32_0 = arith.constant 0 : i32
    %c0_i32_1 = arith.constant 0 : i32
    return %c0_i32, %c0_i32_0 : i32, i32
  }
  func.func @transform_8(%arg0: i32) -> (i32, i32, i32) {
    %c0_i32 = arith.constant 0 : i32
    %c0_i32_0 = arith.constant 0 : i32
    %c0_i32_1 = arith.constant 0 : i32
    return %arg0, %c0_i32, %c0_i32_0 : i32, i32, i32
  }
}

</mosaic_0001>

<bundles_post_ra>
// kernel: _self_attention_pallas_impl.1
= control target key start
LH: loop header
LB: loop body
LE: loop exit
PB: predicated region body
PF: predicated region fallthrough
CT: control target
= control target key end

     0   :  { %13 = vsyncpa [#allocation4], 0  ;;  %s3259_s0 = inlined_call_operand.vmem [shape: f32[2,8,128], index: 0, kind: input, shape index: {}]   ;;  %s3260_s1 = inlined_call_operand.vmem [shape: f32[2,8,128], index: 1, kind: input, shape index: {}]   ;;  %s3261_s2 = inlined_call_operand.vmem [shape: f32[2,8,128], index: 2, kind: input, shape index: {}]   ;;  %s3262_s3 = inlined_call_operand.vmem [shape: f32[128,128], index: 3, kind: input, shape index: {}]   ;;  %s3263_s4 = inlined_call_operand.vmem [shape: f32[128,128], index: 4, kind: input, shape index: {}]   ;;  %s3264_s5 = inlined_call_operand.vmem [shape: f32[128,128], index: 5, kind: input, shape index: {}]   ;;  %s3265_s6 = inlined_call_operand.vmem [shape: f32[128,128], index: 6, kind: input, shape index: {}]   ;;  %s3266_s7 = inlined_call_operand.vmem [shape: f32[1,128], index: 7, kind: input, shape index: {}]   ;;  %s3267_s8 = inlined_call_operand.hbm [shape: f32[2,8,128], index: 8, kind: output, shape index: {}]  }
   0x1   :  { %15 = vsyncpa [#allocation4 + $0x1], 0  ;;  %s2703_s27 = smov 0   ;;  %s2705_s28 = smov 0  }
   0x2   :  { %s2707_s29 = smov 0   ;;  %s2709_s30 = smov 0  }
   0x3 LB: > { %s2724_s9 = sadd.s32 4294967295, %s2646_s30   ;;  %s2149_s10 = sadd.s32 4294967294, %s2646_s30   ;;  %s2646_s30 = sphi %s2709_s30, %s3273_s30   ;;  %s2642_s29 = sphi %s2707_s29, %s3272_s29   ;;  %s2638_s28 = sphi %s2705_s28, %s3271_s28   ;;  %s2634_s27 = sphi %s2703_s27, %s3270_s27  }
   0x4   : > { %s2728_s11 = sadd.s32 1, %s2646_s30   ;;  %s211_s12 = sadd.s32 1, %s2642_s29 }
   0x5   : > { %s208_s13 = ssub.s32 %s2646_s30, %s2728_s11  ;;  %p221_p0 = scmp.ne.s32.totalorder %s2642_s29, %s2638_s28 }
   0x6   : > { %p209_p1 = scmp.eq.s32.totalorder %s208_s13, 0  ;;  %p222_p2 = scmp.eq.s32.totalorder %s2724_s9, 1 }
   0x7   : > { %p227_p3 = scmp.ne.s32.totalorder %s2638_s28, %s2634_s27  ;;  %p228_p4 = scmp.eq.s32.totalorder %s2149_s10, 1 }
   0x8   : > { %s2739_s14 = scalar_select %p209_p1, %s2642_s29, %s211_s12  }
   0x9   : > { %p2741_p5 = por %p222_p2, %p221_p0  ;;  %p2745_p6 = por %p228_p4, %p227_p3 }
   0xa   : > { %p2152_p7 = scmp.ge.s32.totalorder %s2646_s30, 1  ;;  %p282_p8 = scmp.lt.s32.totalorder %s2646_s30, 3 }
   0xc   : > { %p283_p9 = pnand %p2152_p7, %p282_p8 }
   0xd   : > { %p323_p10 = scmp.lt.s32.totalorder (!%p283_p9), %s2724_s9, 1  ;;  %s2651_s24 = smov (!%p283_p9), 96  }
   0xe   : > { %286 = sbr.rel (%p283_p9) target bundleno = 3602 (0xe12), region = 52  ;;  %s2652_s25 = smov (!%p283_p9), 80  }
   0xf   : > { %s2653_s26 = smov (!%p283_p9), 64   ;;  %s2654_s10 = smov (!%p283_p9), 48  }
  0x10   : > { %s2655_s12 = smov (!%p283_p9), 32   ;;  %s2183_s17 = sshll.u32 (!%p283_p9), %s2724_s9, 7 }
  0x13   : > { %v438_v0 = vld [vmem:[%s3263_s4 + $0x78] sm:$0xff]  ;;  %v2648_v2 = vmov 0.0   ;;  %v437_v3 = vld [vmem:[%s3263_s4 + $0x70] sm:$0xff]  ;;  %v436_v5 = vld [vmem:[%s3263_s4 + $0x68] sm:$0xff]  ;;  %s324_s22 = scalar_select %p323_p10, %s2724_s9, 1  ;;  %vm2649_vm0 = vmmov 0  }
  0x14   : > { %v351_v1 = vld [vmem:[%s3262_s3 + $0x78] sm:$0xff]  ;;  %2321 = vmatprep.subr.mxu1 %v2648_v2  ;;  %2286 = vmatprep.subr.mxu0 %v2648_v2  ;;  %v350_v4 = vld [vmem:[%s3262_s3 + $0x70] sm:$0xff]  ;;  %v349_v6 = vld [vmem:[%s3262_s3 + $0x68] sm:$0xff]  ;;  %vm596_vm1 = vcmask 130048   ;;  %vm673_vm2 = vcmask 64512   ;;  %vm929_vm3 = vcmask 261248  }
  0x15   : > { %2322 = vmatpush3.msra.mxu1 %v438_v0  ;;  %2287 = vmatpush3.msra.mxu0 %v351_v1  ;;  %v435_v7 = vld [vmem:[%s3263_s4 + $0x60] sm:$0xff]  ;;  %v434_v9 = vld [vmem:[%s3263_s4 + $0x58] sm:$0xff]  ;;  %v433_v11 = vld [vmem:[%s3263_s4 + $0x50] sm:$0xff]  ;;  %s2855_s18 = sshll.u32 %s324_s22, 3  ;;  %vm1100_vm4 = vcmask 392448   ;;  %vm1271_vm5 = vcmask 523648  }
  0x16   : > { %2323 = vmatprep.subr.mxu1 %v2648_v2  ;;  %2288 = vmatprep.subr.mxu0 %v2648_v2  ;;  %v348_v8 = vld [vmem:[%s3262_s3 + $0x60] sm:$0xff]  ;;  %v347_v10 = vld [vmem:[%s3262_s3 + $0x58] sm:$0xff]  ;;  %v346_v12 = vld [vmem:[%s3262_s3 + $0x50] sm:$0xff]  ;;  %s330_s13 = scalar_lea.vmem %s3260_s1, %s2855_s18  ;;  %s326_s23 = scalar_lea.vmem %s3259_s0, %s2855_s18  ;;  %vm1442_vm6 = vcmask 654848   ;;  %vm1613_vm7 = vcmask 786048   ;;  %vm1784_vm8 = vcmask 917248  }
  0x17   : > { %2324 = vmatpush3.msra.mxu1 %v437_v3  ;;  %2289 = vmatpush3.msra.mxu0 %v350_v4  ;;  %v432_v13 = vld [vmem:[%s3263_s4 + $0x48] sm:$0xff]  ;;  %v431_v15 = vld [vmem:[%s3263_s4 + $0x40] sm:$0xff]  ;;  %v430_v17 = vld [vmem:[%s3263_s4 + $0x38] sm:$0xff]  ;;  %s334_s21 = scalar_lea.vmem %s3261_s2, %s2855_s18  ;;  %s2650_s18 = smov 112   ;;  %vm1955_vm9 = vcmask 1048448  }
  0x18   : > { %2325 = vmatprep.subr.mxu1 %v2648_v2  ;;  %2290 = vmatprep.subr.mxu0 %v2648_v2  ;;  %v345_v14 = vld [vmem:[%s3262_s3 + $0x48] sm:$0xff]  ;;  %v344_v16 = vld [vmem:[%s3262_s3 + $0x40] sm:$0xff]  ;;  %v343_v18 = vld [vmem:[%s3262_s3 + $0x38] sm:$0xff] }
  0x19   : > { %2326 = vmatpush3.msra.mxu1 %v436_v5  ;;  %2291 = vmatpush3.msra.mxu0 %v349_v6  ;;  %v429_v19 = vld [vmem:[%s3263_s4 + $0x30] sm:$0xff]  ;;  %v428_v21 = vld [vmem:[%s3263_s4 + $0x28] sm:$0xff]  ;;  %v427_v23 = vld [vmem:[%s3263_s4 + $0x20] sm:$0xff] }
  0x1a   : > { %2327 = vmatprep.subr.mxu1 %v2648_v2  ;;  %2292 = vmatprep.subr.mxu0 %v2648_v2  ;;  %v342_v20 = vld [vmem:[%s3262_s3 + $0x30] sm:$0xff]  ;;  %v341_v22 = vld [vmem:[%s3262_s3 + $0x28] sm:$0xff]  ;;  %v340_v24 = vld [vmem:[%s3262_s3 + $0x20] sm:$0xff] }
  0x1b   : > { %2328 = vmatpush3.msra.mxu1 %v435_v7  ;;  %2293 = vmatpush3.msra.mxu0 %v348_v8  ;;  %v426_v25 = vld [vmem:[%s3263_s4 + $0x18] sm:$0xff]  ;;  %v425_v27 = vld [vmem:[%s3263_s4 + $0x10] sm:$0xff]  ;;  %v424_v29 = vld [vmem:[%s3263_s4 + $0x8] sm:$0xff] }
  0x1c   : > { %2329 = vmatprep.subr.mxu1 %v2648_v2  ;;  %2294 = vmatprep.subr.mxu0 %v2648_v2  ;;  %v339_v26 = vld [vmem:[%s3262_s3 + $0x18] sm:$0xff]  ;;  %v338_v28 = vld [vmem:[%s3262_s3 + $0x10] sm:$0xff]  ;;  %v337_v30 = vld [vmem:[%s3262_s3 + $0x8] sm:$0xff] }
  0x1d   : > { %2330 = vmatpush3.msra.mxu1 %v434_v9  ;;  %2295 = vmatpush3.msra.mxu0 %v347_v10  ;;  %v423_v31 = vld [vmem:[%s3263_s4] sm:$0xff]  ;;  %v525_v35 = vld [vmem:[%s3264_s5 + $0x78] sm:$0xff]  ;;  %v524_v36 = vld [vmem:[%s3264_s5 + $0x70] sm:$0xff] }
  0x1e   : > { %2331 = vmatprep.subr.mxu1 %v2648_v2  ;;  %2296 = vmatprep.subr.mxu0 %v2648_v2  ;;  %v422_v32 = vld [vmem:[%s330_s13] sm:$0xff]  ;;  %v523_v37 = vld [vmem:[%s3264_s5 + $0x68] sm:$0xff]  ;;  %v521_v39 = vld [vmem:[%s3264_s5 + $0x58] sm:$0xff]  ;;  %s2656_s13 = smov 16  }
  0x1f   : > { %2332 = vmatpush3.msra.mxu1 %v433_v11  ;;  %2297 = vmatpush3.msra.mxu0 %v346_v12  ;;  %v336_v33 = vld [vmem:[%s3262_s3] sm:$0xff]  ;;  %v520_v40 = vld [vmem:[%s3264_s5 + $0x50] sm:$0xff]  ;;  %v519_v41 = vld [vmem:[%s3264_s5 + $0x48] sm:$0xff] }
  0x20   : > { %2333 = vmatprep.subr.mxu1 %v2648_v2  ;;  %2298 = vmatprep.subr.mxu0 %v2648_v2  ;;  %v335_v34 = vld [vmem:[%s326_s23] sm:$0xff]  ;;  %v517_v43 = vld [vmem:[%s3264_s5 + $0x38] sm:$0xff]  ;;  %v516_v44 = vld [vmem:[%s3264_s5 + $0x30] sm:$0xff] }
  0x21   : > { %2334 = vmatpush3.msra.mxu1 %v432_v13  ;;  %2299 = vmatpush3.msra.mxu0 %v345_v14  ;;  %v522_v38 = vld [vmem:[%s3264_s5 + $0x60] sm:$0xff]  ;;  %v515_v45 = vld [vmem:[%s3264_s5 + $0x28] sm:$0xff]  ;;  %v513_v47 = vld [vmem:[%s3264_s5 + $0x18] sm:$0xff] }
  0x22   : > { %2335 = vmatprep.subr.mxu1 %v2648_v2  ;;  %2300 = vmatprep.subr.mxu0 %v2648_v2  ;;  %v518_v42 = vld [vmem:[%s3264_s5 + $0x40] sm:$0xff]  ;;  %v512_v48 = vld [vmem:[%s3264_s5 + $0x10] sm:$0xff]  ;;  %v511_v49 = vld [vmem:[%s3264_s5 + $0x8] sm:$0xff] }
  0x23   : > { %2336 = vmatpush3.msra.mxu1 %v431_v15  ;;  %2301 = vmatpush3.msra.mxu0 %v344_v16  ;;  %v514_v46 = vld [vmem:[%s3264_s5 + $0x20] sm:$0xff] }
  0x24   : > { %2337 = vmatprep.subr.mxu1 %v2648_v2  ;;  %2302 = vmatprep.subr.mxu0 %v2648_v2  ;;  %v510_v50 = vld [vmem:[%s3264_s5] sm:$0xff] }
  0x25   : > { %2338 = vmatpush3.msra.mxu1 %v430_v17  ;;  %2303 = vmatpush3.msra.mxu0 %v343_v18  ;;  %v509_v51 = vld [vmem:[%s334_s21] sm:$0xff] }
  0x26   : > { %2339 = vmatprep.subr.mxu1 %v2648_v2  ;;  %2304 = vmatprep.subr.mxu0 %v2648_v2 }
  0x27   : > { %2340 = vmatpush3.msra.mxu1 %v429_v19  ;;  %2305 = vmatpush3.msra.mxu0 %v342_v20 }
  0x28   : > { %2341 = vmatprep.subr.mxu1 %v2648_v2  ;;  %2306 = vmatprep.subr.mxu0 %v2648_v2 }
  0x29   : > { %2342 = vmatpush3.msra.mxu1 %v428_v21  ;;  %2307 = vmatpush3.msra.mxu0 %v341_v22 }
  0x2a   : > { %2343 = vmatprep.subr.mxu1 %v2648_v2  ;;  %2308 = vmatprep.subr.mxu0 %v2648_v2 }
  0x2b   : > { %2344 = vmatpush3.msra.mxu1 %v427_v23  ;;  %2309 = vmatpush3.msra.mxu0 %v340_v24 }
  0x2c   : > { %2345 = vmatprep.subr.mxu1 %v2648_v2  ;;  %2310 = vmatprep.subr.mxu0 %v2648_v2 }
  0x2d   : > { %2346 = vmatpush3.msra.mxu1 %v426_v25  ;;  %2311 = vmatpush3.msra.mxu0 %v339_v26 }
  0x2e   : > { %2347 = vmatprep.subr.mxu1 %v2648_v2  ;;  %2312 = vmatprep.subr.mxu0 %v2648_v2 }
  0x2f   : > { %2348 = vmatpush3.msra.mxu1 %v425_v27  ;;  %2313 = vmatpush3.msra.mxu0 %v338_v28 }
  0x30   : > { %2349 = vmatprep.subr.mxu1 %v2648_v2  ;;  %2314 = vmatprep.subr.mxu0 %v2648_v2 }
  0x31   : > { %2350 = vmatpush3.msra.mxu1 %v424_v29  ;;  %2315 = vmatpush3.msra.mxu0 %v337_v30 }
  0x32   : > { %2351 = vmatprep.subr.mxu1 %v2648_v2  ;;  %2353 = vmatprep.mubr.msk.f32.mxu1 %vm2649_vm0, %v2648_v2 }
  0x33   : > { %2352 = vmatpush3.msra.mxu1 %v423_v31  ;;  %2316 = vmatprep.subr.mxu0 %v2648_v2 }
  0x34   : > { %2354 = vmatmul.mubr.f32.vlgmr.msra.gmra.mxu1 %v422_v32  ;;  %2317 = vmatpush3.msra.mxu0 %v336_v33 }
  0x35   : > { %2318 = vmatprep.mubr.msk.f32.mxu0 %vm2649_vm0, %v2648_v2  ;;  %2356 = vmatprep.subr.mxu0 %v2648_v2 }
  0x36   : > { %2319 = vmatmul.mubr.f32.vlgmr.msra.gmra.mxu0 %v335_v34  ;;  %2391 = vmatprep.subr.mxu1 %v2648_v2 }
  0x37   : > { %2393 = vmatprep.mubr.msk.f32.mxu1 %vm2649_vm0, %v2648_v2  ;;  %2388 = vmatprep.mubr.msk.f32.mxu0 %vm2649_vm0, %v2648_v2 }
  0x38   : > { %2357 = vmatpush3.msra.mxu0 %v525_v35 }
  0x39   : > { %2358 = vmatprep.subr.mxu0 %v2648_v2 }
  0x3a   : > { %2359 = vmatpush3.msra.mxu0 %v524_v36 }
  0x3b   : > { %2360 = vmatprep.subr.mxu0 %v2648_v2 }
  0x3c   : > { %2361 = vmatpush3.msra.mxu0 %v523_v37 }
  0x3d   : > { %2362 = vmatprep.subr.mxu0 %v2648_v2 }
  0x3e   : > { %2363 = vmatpush3.msra.mxu0 %v522_v38 }
  0x3f   : > { %2364 = vmatprep.subr.mxu0 %v2648_v2 }
  0x40   : > { %2365 = vmatpush3.msra.mxu0 %v521_v39 }
  0x41   : > { %2366 = vmatprep.subr.mxu0 %v2648_v2 }
  0x42   : > { %2367 = vmatpush3.msra.mxu0 %v520_v40 }
  0x43   : > { %2368 = vmatprep.subr.mxu0 %v2648_v2 }
  0x44   : > { %2369 = vmatpush3.msra.mxu0 %v519_v41 }
  0x45   : > { %2370 = vmatprep.subr.mxu0 %v2648_v2 }
  0x46   : > { %2371 = vmatpush3.msra.mxu0 %v518_v42 }
  0x47   : > { %2372 = vmatprep.subr.mxu0 %v2648_v2 }
  0x48   : > { %2373 = vmatpush3.msra.mxu0 %v517_v43 }
  0x49   : > { %2374 = vmatprep.subr.mxu0 %v2648_v2 }
  0x4a   : > { %2375 = vmatpush3.msra.mxu0 %v516_v44 }
  0x4b   : > { %2376 = vmatprep.subr.mxu0 %v2648_v2 }
  0x4c   : > { %2377 = vmatpush3.msra.mxu0 %v515_v45 }
  0x4d   : > { %2378 = vmatprep.subr.mxu0 %v2648_v2 }
  0x4e   : > { %2379 = vmatpush3.msra.mxu0 %v514_v46 }
  0x4f   : > { %2380 = vmatprep.subr.mxu0 %v2648_v2 }
  0x50   : > { %2381 = vmatpush3.msra.mxu0 %v513_v47 }
  0x51   : > { %2382 = vmatprep.subr.mxu0 %v2648_v2 }
  0x52   : > { %2383 = vmatpush3.msra.mxu0 %v512_v48 }
  0x53   : > { %2384 = vmatprep.subr.mxu0 %v2648_v2 }
  0x54   : > { %2385 = vmatpush3.msra.mxu0 %v511_v49 }
  0x55   : > { %2386 = vmatprep.subr.mxu0 %v2648_v2 }
  0x56   : > { %2387 = vmatpush3.msra.mxu0 %v510_v50 }
  0x57   : > { %2389 = vmatmul.mubr.f32.vlgmr.msra.gmra.mxu0 %v509_v51  ;;  %2471 = vmatprep.subr.mxu0 %v2648_v2 }
  0x58   : > { %2503 = vmatprep.mubr.msk.f32.mxu0 %vm2649_vm0, %v2648_v2 }
  0xf4   : > { %v2971_v52 = vpop.f32.mrf.mxu1 }
  0xf5   : > { %2392 = vmatpush3.xpose.msk.msra.mxu1 %vm596_vm1, %v2971_v52 }
  0xf6   : > { %v2975_v53 = vpop.f32.mrf.mxu0  ;;  %v2355_v54 = vpop.f32.mrf.mxu1  ;;  %2396 = vmatprep.subr.mxu1 %v2648_v2 }
  0xf7   : > { %759 = vrot.lane.b32.xlu1 %v2975_v53, %s2650_s18 }
  0xf8   : > { %v2320_v55 = vpop.f32.mrf.mxu0  ;;  %2394 = vmatmul.mubr.msk.f32.vlgmr.msra.gmra.mxu1 %vm596_vm1, %v2975_v53 }
  0xf9   : > { %2398 = vmatprep.mubr.msk.f32.mxu1 %vm2649_vm0, %v2648_v2 }
 0x117   : > { %v2984_v56 = vpop.f32.mrf.mxu0 }
 0x118   : > { %2397 = vmatpush3.msra.mxu1 %v2984_v56 }
 0x119   : > { %v2390_v57 = vpop.f32.mrf.mxu0  ;;  %2401 = vmatprep.subr.mxu1 %v2648_v2 }
 0x169   : > { %v760_v3 = vpop.permute.xlu1 %759 }
 0x1b8   : > { %v669_v58 = vpop.f32.mrf.mxu1 }
 0x1b9   : > { %v674_v59 = vsel %vm673_vm2, %v669_v58, -inf }
 0x1ba   : > { %675 = vmax.xlane.f32.xlu0 %v674_v59  ;;  %v2395_v60 = vpop.f32.mrf.mxu1 }
 0x1d0   : > { %761 = vrot.lane.b32.xlu0 %v2971_v52, %s2650_s18 }
 0x1d4   : > { %847 = vrot.lane.b32.xlu0 %v2984_v56, %s2650_s18 }
 0x1d8   : > { %933 = vrot.lane.b32.xlu0 %v2971_v52, %s2651_s24 }
 0x1dc   : > { %931 = vrot.lane.b32.xlu0 %v2975_v53, %s2651_s24 }
 0x243   : > { %v676_v61 = vpop.xlane.xlu0 %675 }
 0x244   : > { %v677_v62 = vsub.f32 %v669_v58, %v676_v61 }
 0x246   : > { %v678_v63 = vmul.f32 1.442695, %v677_v62 }
 0x247   : > { %v762_v0 = vpop.permute.xlu0 %761 }
 0x248   : > { %2554 = vpow2.f32 %v678_v63 }
 0x24b   : > { %v848_v4 = vpop.permute.xlu0 %847 }
 0x24f   : > { %v934_v13 = vpop.permute.xlu0 %933 }
 0x253   : > { %v932_v15 = vpop.permute.xlu0 %931 }
 0x255   : > { %v2997_v1 = vpop.eup %2554 }
 0x256   : > { %2399 = vmatmul.mubr.msk.f32.vlgmr.msra.gmra.mxu1 %vm673_vm2, %v2997_v1 }
 0x257   : > { %2402 = vmatpush3.xpose.msk.msra.mxu1 %vm596_vm1, %v762_v0  ;;  %2403 = vmatprep.mubr.msk.f32.mxu1 %vm2649_vm0, %v2648_v2 }
 0x258   : > { %2406 = vmatprep.subr.mxu1 %v2648_v2 }
 0x25a   : > { %2404 = vmatmul.mubr.msk.f32.vlgmr.msra.gmra.mxu1 %vm596_vm1, %v760_v3 }
 0x25b   : > { %2407 = vmatpush3.msra.mxu1 %v848_v4  ;;  %2408 = vmatprep.mubr.msk.f32.mxu1 %vm2649_vm0, %v2648_v2 }
 0x25c   : > { %2411 = vmatprep.subr.mxu1 %v2648_v2 }
 0x316   : > { %v3009_v5 = vpop.f32.mrf.mxu1 }
 0x318   : > { %v2400_v6 = vpop.f32.mrf.mxu1 }
 0x31a   : > { %v833_v7 = vpop.f32.mrf.mxu1 }
 0x31b   : > { %v837_v8 = vsel %vm673_vm2, %v833_v7, -inf }
 0x31c   : > { %838 = vmax.xlane.f32.xlu1 %v837_v8  ;;  %v2405_v9 = vpop.f32.mrf.mxu1 }
 0x32d   : > { %1018 = vrot.lane.b32.xlu1 %v2984_v56, %s2651_s24 }
 0x331   : > { %1104 = vrot.lane.b32.xlu1 %v2971_v52, %s2652_s25 }
 0x335   : > { %1102 = vrot.lane.b32.xlu1 %v2975_v53, %s2652_s25 }
 0x3a5   : > { %v839_v10 = vpop.xlane.xlu1 %838 }
 0x3a6   : > { %v840_v11 = vsub.f32 %v833_v7, %v839_v10 }
 0x3a8   : > { %v841_v12 = vmul.f32 1.442695, %v840_v11  ;;  %v680_v11 = vsel %vm673_vm2, %v2997_v1, 0.0 }
 0x3a9   : > { %v1019_v16 = vpop.permute.xlu1 %1018 }
 0x3aa   : > { %2556 = vpow2.f32 %v841_v12 }
 0x3ad   : > { %v1105_v25 = vpop.permute.xlu1 %1104 }
 0x3b1   : > { %v1103_v27 = vpop.permute.xlu1 %1102 }
 0x3b7   : > { %v3018_v14 = vpop.eup %2556 }
 0x3b8   : > { %2409 = vmatmul.mubr.msk.f32.vlgmr.msra.gmra.mxu1 %vm673_vm2, %v3018_v14  ;;  %v843_v10 = vsel %vm673_vm2, %v3018_v14, 0.0 }
 0x3b9   : > { %2412 = vmatpush3.xpose.msk.msra.mxu1 %vm596_vm1, %v934_v13  ;;  %2413 = vmatprep.mubr.msk.f32.mxu1 %vm2649_vm0, %v2648_v2 }
 0x3ba   : > { %2416 = vmatprep.subr.mxu1 %v2648_v2 }
 0x3bc   : > { %2414 = vmatmul.mubr.msk.f32.vlgmr.msra.gmra.mxu1 %vm596_vm1, %v932_v15 }
 0x3bd   : > { %2417 = vmatpush3.msra.mxu1 %v1019_v16  ;;  %2418 = vmatprep.mubr.msk.f32.mxu1 %vm2649_vm0, %v2648_v2 }
 0x3be   : > { %2421 = vmatprep.subr.mxu1 %v2648_v2 }
 0x478   : > { %v3030_v17 = vpop.f32.mrf.mxu1 }
 0x47a   : > { %v2410_v18 = vpop.f32.mrf.mxu1 }
 0x47c   : > { %v1005_v19 = vpop.f32.mrf.mxu1 }
 0x47d   : > { %v1009_v20 = vsel %vm673_vm2, %v1005_v19, -inf }
 0x47e   : > { %1010 = vmax.xlane.f32.xlu0 %v1009_v20  ;;  %v2415_v21 = vpop.f32.mrf.mxu1 }
 0x494   : > { %1189 = vrot.lane.b32.xlu0 %v2984_v56, %s2652_s25 }
 0x498   : > { %1275 = vrot.lane.b32.xlu0 %v2971_v52, %s2653_s26 }
 0x49c   : > { %1273 = vrot.lane.b32.xlu0 %v2975_v53, %s2653_s26 }
 0x507   : > { %v1011_v22 = vpop.xlane.xlu0 %1010 }
 0x508   : > { %v1012_v23 = vsub.f32 %v1005_v19, %v1011_v22 }
 0x50a   : > { %v1013_v24 = vmul.f32 1.442695, %v1012_v23 }
 0x50b   : > { %v1190_v28 = vpop.permute.xlu0 %1189 }
 0x50c   : > { %2558 = vpow2.f32 %v1013_v24 }
 0x50f   : > { %v1276_v37 = vpop.permute.xlu0 %1275 }
 0x513   : > { %v1274_v39 = vpop.permute.xlu0 %1273 }
 0x519   : > { %v3039_v26 = vpop.eup %2558 }
 0x51a   : > { %2419 = vmatmul.mubr.msk.f32.vlgmr.msra.gmra.mxu1 %vm673_vm2, %v3039_v26 }
 0x51b   : > { %2422 = vmatpush3.xpose.msk.msra.mxu1 %vm596_vm1, %v1105_v25  ;;  %2423 = vmatprep.mubr.msk.f32.mxu1 %vm2649_vm0, %v2648_v2 }
 0x51c   : > { %2426 = vmatprep.subr.mxu1 %v2648_v2 }
 0x51e   : > { %2424 = vmatmul.mubr.msk.f32.vlgmr.msra.gmra.mxu1 %vm596_vm1, %v1103_v27 }
 0x51f   : > { %2427 = vmatpush3.msra.mxu1 %v1190_v28  ;;  %2428 = vmatprep.mubr.msk.f32.mxu1 %vm2649_vm0, %v2648_v2  ;;  %v1015_v28 = vsel %vm673_vm2, %v3039_v26, 0.0 }
 0x520   : > { %2431 = vmatprep.subr.mxu1 %v2648_v2 }
 0x5da   : > { %v3051_v29 = vpop.f32.mrf.mxu1 }
 0x5dc   : > { %v2420_v30 = vpop.f32.mrf.mxu1 }
 0x5de   : > { %v1176_v31 = vpop.f32.mrf.mxu1 }
 0x5df   : > { %v1180_v32 = vsel %vm673_vm2, %v1176_v31, -inf }
 0x5e0   : > { %1181 = vmax.xlane.f32.xlu1 %v1180_v32  ;;  %v2425_v33 = vpop.f32.mrf.mxu1 }
 0x5f1   : > { %1360 = vrot.lane.b32.xlu1 %v2984_v56, %s2653_s26 }
 0x5f5   : > { %1446 = vrot.lane.b32.xlu1 %v2971_v52, %s2654_s10 }
 0x5f9   : > { %1444 = vrot.lane.b32.xlu1 %v2975_v53, %s2654_s10 }
 0x669   : > { %v1182_v34 = vpop.xlane.xlu1 %1181 }
 0x66a   : > { %v1183_v35 = vsub.f32 %v1176_v31, %v1182_v34 }
 0x66c   : > { %v1184_v36 = vmul.f32 1.442695, %v1183_v35 }
 0x66d   : > { %v1361_v40 = vpop.permute.xlu1 %1360 }
 0x66e   : > { %2560 = vpow2.f32 %v1184_v36 }
 0x671   : > { %v1447_v49 = vpop.permute.xlu1 %1446 }
 0x675   : > { %v1445_v51 = vpop.permute.xlu1 %1444 }
 0x67b   : > { %v3060_v38 = vpop.eup %2560 }
 0x67c   : > { %2429 = vmatmul.mubr.msk.f32.vlgmr.msra.gmra.mxu1 %vm673_vm2, %v3060_v38  ;;  %v1186_v30 = vsel %vm673_vm2, %v3060_v38, 0.0 }
 0x67d   : > { %2432 = vmatpush3.xpose.msk.msra.mxu1 %vm596_vm1, %v1276_v37  ;;  %2433 = vmatprep.mubr.msk.f32.mxu1 %vm2649_vm0, %v2648_v2 }
 0x67e   : > { %2436 = vmatprep.subr.mxu1 %v2648_v2 }
 0x680   : > { %2434 = vmatmul.mubr.msk.f32.vlgmr.msra.gmra.mxu1 %vm596_vm1, %v1274_v39 }
 0x681   : > { %2437 = vmatpush3.msra.mxu1 %v1361_v40  ;;  %2438 = vmatprep.mubr.msk.f32.mxu1 %vm2649_vm0, %v2648_v2 }
 0x682   : > { %2441 = vmatprep.subr.mxu1 %v2648_v2 }
 0x73c   : > { %v3072_v41 = vpop.f32.mrf.mxu1 }
 0x73e   : > { %v2430_v42 = vpop.f32.mrf.mxu1 }
 0x740   : > { %v1347_v43 = vpop.f32.mrf.mxu1 }
 0x741   : > { %v1351_v44 = vsel %vm673_vm2, %v1347_v43, -inf }
 0x742   : > { %1352 = vmax.xlane.f32.xlu0 %v1351_v44  ;;  %v2435_v45 = vpop.f32.mrf.mxu1 }
 0x758   : > { %1531 = vrot.lane.b32.xlu0 %v2984_v56, %s2654_s10 }
 0x75c   : > { %1617 = vrot.lane.b32.xlu0 %v2971_v52, %s2655_s12 }
 0x760   : > { %1615 = vrot.lane.b32.xlu0 %v2975_v53, %s2655_s12 }
 0x7cb   : > { %v1353_v46 = vpop.xlane.xlu0 %1352 }
 0x7cc   : > { %v1354_v47 = vsub.f32 %v1347_v43, %v1353_v46 }
 0x7ce   : > { %v1355_v48 = vmul.f32 1.442695, %v1354_v47 }
 0x7cf   : > { %v1532_v54 = vpop.permute.xlu0 %1531 }
 0x7d0   : > { %2562 = vpow2.f32 %v1355_v48 }
 0x7d3   : > { %v1618_v0 = vpop.permute.xlu0 %1617 }
 0x7d7   : > { %v1616_v4 = vpop.permute.xlu0 %1615 }
 0x7dd   : > { %v3081_v50 = vpop.eup %2562 }
 0x7de   : > { %2439 = vmatmul.mubr.msk.f32.vlgmr.msra.gmra.mxu1 %vm673_vm2, %v3081_v50 }
 0x7df   : > { %2442 = vmatpush3.xpose.msk.msra.mxu1 %vm596_vm1, %v1447_v49  ;;  %2443 = vmatprep.mubr.msk.f32.mxu1 %vm2649_vm0, %v2648_v2 }
 0x7e0   : > { %2446 = vmatprep.subr.mxu1 %v2648_v2 }
 0x7e2   : > { %2444 = vmatmul.mubr.msk.f32.vlgmr.msra.gmra.mxu1 %vm596_vm1, %v1445_v51 }
 0x7e3   : > { %2447 = vmatpush3.msra.mxu1 %v1532_v54  ;;  %2448 = vmatprep.mubr.msk.f32.mxu1 %vm2649_vm0, %v2648_v2 }
 0x7e4   : > { %2451 = vmatprep.subr.mxu1 %v2648_v2 }
 0x89e   : > { %v3093_v55 = vpop.f32.mrf.mxu1 }
 0x8a0   : > { %v2440_v57 = vpop.f32.mrf.mxu1 }
 0x8a2   : > { %v1518_v58 = vpop.f32.mrf.mxu1 }
 0x8a3   : > { %v1522_v59 = vsel %vm673_vm2, %v1518_v58, -inf }
 0x8a4   : > { %1523 = vmax.xlane.f32.xlu1 %v1522_v59  ;;  %v2445_v60 = vpop.f32.mrf.mxu1  ;;  %v1969_v59 = vld [vmem:[%s3265_s6 + $0x58] sm:$0xff] }
 0x8a5   : > { %v1968_v60 = vld [vmem:[%s3265_s6 + $0x50] sm:$0xff] }
 0x8b5   : > { %1702 = vrot.lane.b32.xlu1 %v2984_v56, %s2655_s12 }
 0x8b9   : > { %1788 = vrot.lane.b32.xlu1 %v2971_v52, %s2656_s13 }
 0x8bd   : > { %1786 = vrot.lane.b32.xlu1 %v2975_v53, %s2656_s13 }
 0x92d   : > { %v1524_v61 = vpop.xlane.xlu1 %1523 }
 0x92e   : > { %v1525_v62 = vsub.f32 %v1518_v58, %v1524_v61  ;;  %v1972_v58 = vld [vmem:[%s3265_s6 + $0x70] sm:$0xff]  ;;  %v1967_v61 = vld [vmem:[%s3265_s6 + $0x48] sm:$0xff] }
 0x930   : > { %v1526_v63 = vmul.f32 1.442695, %v1525_v62  ;;  %v1966_v62 = vld [vmem:[%s3265_s6 + $0x40] sm:$0xff] }
 0x931   : > { %v1703_v52 = vpop.permute.xlu1 %1702 }
 0x932   : > { %2564 = vpow2.f32 %v1526_v63  ;;  %v1965_v63 = vld [vmem:[%s3265_s6 + $0x38] sm:$0xff] }
 0x935   : > { %v1789_v16 = vpop.permute.xlu1 %1788 }
 0x93f   : > { %v2565_v3 = vpop.eup %2564 }
 0x940   : > { %2449 = vmatmul.mubr.msk.f32.vlgmr.msra.gmra.mxu1 %vm673_vm2, %v2565_v3  ;;  %v1528_v31 = vsel %vm673_vm2, %v2565_v3, 0.0  ;;  %v1963_v3 = vld [vmem:[%s3265_s6 + $0x28] sm:$0xff] }
 0x941   : > { %2452 = vmatpush3.xpose.msk.msra.mxu1 %vm596_vm1, %v1618_v0  ;;  %2453 = vmatprep.mubr.msk.f32.mxu1 %vm2649_vm0, %v2648_v2  ;;  %v1964_v0 = vld [vmem:[%s3265_s6 + $0x30] sm:$0xff] }
 0x942   : > { %2456 = vmatprep.subr.mxu1 %v2648_v2 }
 0x944   : > { %2454 = vmatmul.mubr.msk.f32.vlgmr.msra.gmra.mxu1 %vm596_vm1, %v1616_v4  ;;  %v1962_v4 = vld [vmem:[%s3265_s6 + $0x20] sm:$0xff] }
 0x945   : > { %2457 = vmatpush3.msra.mxu1 %v1703_v52  ;;  %2458 = vmatprep.mubr.msk.f32.mxu1 %vm2649_vm0, %v2648_v2 }
 0x946   : > { %2461 = vmatprep.subr.mxu1 %v2648_v2 }
 0xa00   : > { %v3111_v53 = vpop.f32.mrf.mxu1 }
 0xa02   : > { %v2450_v6 = vpop.f32.mrf.mxu1 }
 0xa04   : > { %v1689_v7 = vpop.f32.mrf.mxu1 }
 0xa05   : > { %v1693_v8 = vsel %vm673_vm2, %v1689_v7, -inf }
 0xa06   : > { %1694 = vmax.xlane.f32.xlu0 %v1693_v8  ;;  %v2455_v9 = vpop.f32.mrf.mxu1 }
 0xa1c   : > { %1873 = vrot.lane.b32.xlu0 %v2984_v56, %s2656_s13  ;;  %v1787_v56 = vpop.permute.xlu1 %1786 }
 0xa3b   : > { %844 = vadd.xlane.f32.xlu0 %v843_v10 }
 0xa3f   : > { %681 = vadd.xlane.f32.xlu0 %v680_v11  ;;  %v1961_v11 = vld [vmem:[%s3265_s6 + $0x18] sm:$0xff] }
 0xa8f   : > { %v1695_v12 = vpop.xlane.xlu0 %1694 }
 0xa90   : > { %v1696_v13 = vsub.f32 %v1689_v7, %v1695_v12  ;;  %v1960_v12 = vld [vmem:[%s3265_s6 + $0x10] sm:$0xff] }
 0xa92   : > { %v1697_v15 = vmul.f32 1.442695, %v1696_v13  ;;  %v1959_v13 = vld [vmem:[%s3265_s6 + $0x8] sm:$0xff] }
 0xa93   : > { %v1874_v14 = vpop.permute.xlu0 %1873 }
 0xa94   : > { %2566 = vpow2.f32 %v1697_v15  ;;  %v1958_v15 = vld [vmem:[%s3265_s6] sm:$0xff] }
 0xaa1   : > { %v2567_v18 = vpop.eup %2566 }
 0xaa2   : > { %2459 = vmatmul.mubr.msk.f32.vlgmr.msra.gmra.mxu1 %vm673_vm2, %v2567_v18  ;;  %v1699_v32 = vsel %vm673_vm2, %v2567_v18, 0.0 }
 0xaa3   : > { %2462 = vmatpush3.xpose.msk.msra.mxu1 %vm596_vm1, %v1789_v16  ;;  %2463 = vmatprep.mubr.msk.f32.mxu1 %vm2649_vm0, %v2648_v2 }
 0xaa4   : > { %2466 = vmatprep.subr.mxu1 %v2648_v2 }
 0xaa6   : > { %2464 = vmatmul.mubr.msk.f32.vlgmr.msra.gmra.mxu1 %vm596_vm1, %v1787_v56 }
 0xaa7   : > { %2467 = vmatpush3.msra.mxu1 %v1874_v14  ;;  %2468 = vmatprep.mubr.msk.f32.mxu1 %vm2649_vm0, %v2648_v2 }
 0xac4   : > { %v845_v1 = vpop.xlane.xlu0 %844 }
 0xac8   : > { %v682_v19 = vpop.xlane.xlu0 %681 }
 0xac9   : > { %2568 = vrcp.f32 %v682_v19 }
 0xad6   : > { %v2569_v20 = vpop.eup %2568 }
 0xad7   : > { %v757_v21 = vmul.f32 %v2569_v20, %v3009_v5  ;;  %v1357_v5 = vsel %vm673_vm2, %v3081_v50, 0.0  ;;  %v2181_v20 = vld [vmem:[%s3266_s7] ss:$0 sm:$0xff] }
 0xad9   : > { %758 = vst.msk [vmem:[#allocation2] sm:$0xff] %vm596_vm1, %v757_v21 }
 0xb62   : > { %v1774_v22 = vpop.f32.mrf.mxu1 }
 0xb64   : > { %v2460_v23 = vpop.f32.mrf.mxu1 }
 0xb66   : > { %v1860_v24 = vpop.f32.mrf.mxu1 }
 0xb67   : > { %v1864_v25 = vsel %vm673_vm2, %v1860_v24, -inf }
 0xb68   : > { %1865 = vmax.xlane.f32.xlu1 %v1864_v25  ;;  %v2465_v27 = vpop.f32.mrf.mxu1 }
 0xb6c   : > { %1016 = vadd.xlane.f32.xlu1 %v1015_v28 }
 0xb70   : > { %1187 = vadd.xlane.f32.xlu1 %v1186_v30 }
 0xb74   : > { %1358 = vadd.xlane.f32.xlu1 %v1357_v5 }
 0xb78   : > { %1529 = vadd.xlane.f32.xlu1 %v1528_v31 }
 0xb7c   : > { %1700 = vadd.xlane.f32.xlu1 %v1699_v32 }
 0xbf1   : > { %v1866_v33 = vpop.xlane.xlu1 %1865 }
 0xbf2   : > { %v1867_v34 = vsub.f32 %v1860_v24, %v1866_v33 }
 0xbf4   : > { %v1868_v35 = vmul.f32 1.442695, %v1867_v34 }
 0xbf5   : > { %v1017_v36 = vpop.xlane.xlu1 %1016 }
 0xbf6   : > { %2570 = vpow2.f32 %v1868_v35 }
 0xbf7   : > { %2572 = vrcp.f32 %v1017_v36 }
 0xbf9   : > { %v1188_v26 = vpop.xlane.xlu1 %1187 }
 0xbfd   : > { %v1359_v37 = vpop.xlane.xlu1 %1358 }
 0xc01   : > { %v1530_v38 = vpop.xlane.xlu1 %1529 }
 0xc02   : > { %2574 = vrcp.f32 %v1530_v38 }
 0xc03   : > { %v2571_v39 = vpop.eup %2570  ;;  %2576 = vrcp.f32 %v845_v1 }
 0xc04   : > { %v2573_v40 = vpop.eup %2572  ;;  %2469 = vmatmul.mubr.msk.f32.vlgmr.msra.gmra.mxu1 %vm673_vm2, %v2571_v39  ;;  %v1870_v42 = vsel %vm673_vm2, %v2571_v39, 0.0  ;;  %2578 = vrcp.f32 %v1188_v26 }
 0xc05   : > { %1871 = vadd.xlane.f32.xlu1 %v1870_v42  ;;  %v1095_v43 = vmul.f32 %v2573_v40, %v3051_v29  ;;  %2580 = vrcp.f32 %v1359_v37  ;;  %v1701_v44 = vpop.xlane.xlu1 %1700 }
 0xc06   : > { %2582 = vrcp.f32 %v1701_v44 }
 0xc07   : > { %1097 = vrot.lane.b32.xlu0 %v1095_v43, %s2655_s12 }
 0xc0f   : > { %v2575_v45 = vpop.eup %2574 }
 0xc10   : > { %v1608_v46 = vmul.f32 %v2575_v45, %v3111_v53  ;;  %v2577_v47 = vpop.eup %2576 }
 0xc11   : > { %v924_v48 = vmul.f32 %v2577_v47, %v3030_v17  ;;  %v2579_v49 = vpop.eup %2578  ;;  %v1973_v17 = vld [vmem:[%s3265_s6 + $0x78] sm:$0xff] }
 0xc12   : > { %1610 = vrot.lane.b32.xlu0 %v1608_v46, %s2652_s25  ;;  %v1266_v50 = vmul.f32 %v2579_v49, %v3072_v41  ;;  %v2581_v29 = vpop.eup %2580  ;;  %2472 = vmatpush3.msra.mxu0 %v1973_v17  ;;  %v1971_v41 = vld [vmem:[%s3265_s6 + $0x68] sm:$0xff] }
 0xc13   : > { %v1437_v51 = vmul.f32 %v2581_v29, %v3093_v55  ;;  %v2583_v54 = vpop.eup %2582  ;;  %2473 = vmatprep.subr.mxu0 %v2648_v2  ;;  %v1970_v55 = vld [vmem:[%s3265_s6 + $0x60] sm:$0xff] }
 0xc14   : > { %v1779_v57 = vmul.f32 %v2583_v54, %v1774_v22  ;;  %2474 = vmatpush3.msra.mxu0 %v1972_v58 }
 0xc15   : > { %2475 = vmatprep.subr.mxu0 %v2648_v2 }
 0xc16   : > { %926 = vrot.lane.b32.xlu1 %v924_v48, %s2656_s13  ;;  %2476 = vmatpush3.msra.mxu0 %v1971_v41 }
 0xc17   : > { %2477 = vmatprep.subr.mxu0 %v2648_v2 }
 0xc18   : > { %2478 = vmatpush3.msra.mxu0 %v1970_v55 }
 0xc19   : > { %2479 = vmatprep.subr.mxu0 %v2648_v2 }
 0xc1a   : > { %1268 = vrot.lane.b32.xlu1 %v1266_v50, %s2654_s10  ;;  %2480 = vmatpush3.msra.mxu0 %v1969_v59 }
 0xc1b   : > { %2481 = vmatprep.subr.mxu0 %v2648_v2 }
 0xc1c   : > { %2482 = vmatpush3.msra.mxu0 %v1968_v60 }
 0xc1d   : > { %2483 = vmatprep.subr.mxu0 %v2648_v2 }
 0xc1e   : > { %1439 = vrot.lane.b32.xlu1 %v1437_v51, %s2653_s26  ;;  %2484 = vmatpush3.msra.mxu0 %v1967_v61  ;;  %s320_s26 = sand.u32 1, %s2638_s28  }
 0xc1f   : > { %2485 = vmatprep.subr.mxu0 %v2648_v2  ;;  %s2153_s10 = sshll.u32 %s320_s26, 3  ;;  %s2053_s22 = scalar_lea.sflag [#allocation4], %s320_s26 }
 0xc20   : > { %2486 = vmatpush3.msra.mxu0 %v1966_v62  ;;  %s322_s19 = scalar_lea.vmem [#allocation3], %s2153_s10 }
 0xc21   : > { %2487 = vmatprep.subr.mxu0 %v2648_v2  ;;  %s2066_s20 = sshll.u32 %s322_s19, 4  ;;  %s2067_s20 = int_to_ptr.vmem [resolvable:$true] %s2066_s20 }
 0xc22   : > { %1781 = vrot.lane.b32.xlu1 %v1779_v57, %s2651_s24  ;;  %2488 = vmatpush3.msra.mxu0 %v1965_v63  ;;  %s2586_s25 = scalar_lea.vmem %s2067_s20, 128  ;;  %s2657_s24 = smov [#allocation3]  }
 0xc23   : > { %2489 = vmatprep.subr.mxu0 %v2648_v2  ;;  %p2587_p11 = scmp.ne.s32.totalorder %s2067_s20, %s2586_s25  ;;  %s2590_s9 = sshll.u32 %s2657_s24, 4  ;;  %s2591_s9 = int_to_ptr.vmem [resolvable:$false] %s2590_s9 }
 0xc24   : > { %2490 = vmatpush3.msra.mxu0 %v1964_v0  ;;  %s2592_s10 = scalar_lea.vmem %s2591_s9, 256  ;;  %p2593_p0 = scmp.lt.s32.totalorder %s2067_s20, %s2591_s9 }
 0xc25   : > { %2491 = vmatprep.subr.mxu0 %v2648_v2  ;;  %p2588_p12 = pnand %p2587_p11, %p2741_p5  ;;  %p2594_p1 = scmp.lt.s32.totalorder %s2592_s10, %s2586_s25 }
 0xc26   : > { %2492 = vmatpush3.msra.mxu0 %v1963_v3 }
 0xc27   : > { %2493 = vmatprep.subr.mxu0 %v2648_v2  ;;  %p2589_p13 = pneg %p2588_p12  ;;  %p2595_p2 = por %p2594_p1, %p2593_p0 }
 0xc28   : > { %2494 = vmatpush3.msra.mxu0 %v1962_v4 }
 0xc29   : > { %2495 = vmatprep.subr.mxu0 %v2648_v2  ;;  %p2596_p3 = pnand %p2595_p2, %p2589_p13 }
 0xc2a   : > { %2496 = vmatpush3.msra.mxu0 %v1961_v11 }
 0xc2b   : > { %2497 = vmatprep.subr.mxu0 %v2648_v2 }
 0xc2c   : > { %2498 = vmatpush3.msra.mxu0 %v1960_v12 }
 0xc2d   : > { %2499 = vmatprep.subr.mxu0 %v2648_v2 }
 0xc2e   : > { %2500 = vmatpush3.msra.mxu0 %v1959_v13 }
 0xc2f   : > { %2501 = vmatprep.subr.mxu0 %v2648_v2 }
 0xc30   : > { %2502 = vmatpush3.msra.mxu0 %v1958_v15 }
 0xc79   : > { %v1098_v6 = vpop.permute.xlu0 %1097 }
 0xc84   : > { %v1611_v9 = vpop.permute.xlu0 %1610 }
 0xc8e   : > { %v1872_v52 = vpop.xlane.xlu1 %1871 }
 0xc8f   : > { %2584 = vrcp.f32 %v1872_v52 }
 0xc92   : > { %v927_v53 = vpop.permute.xlu1 %926 }
 0xc93   : > { %930 = vst.msk [vmem:[#allocation2] sm:$0xff] %vm929_vm3, %v927_v53 }
 0xc94   : > { %1101 = vst.msk [vmem:[#allocation2] sm:$0xff] %vm1100_vm4, %v1098_v6 }
 0xc96   : > { %v1269_v7 = vpop.permute.xlu1 %1268 }
 0xc97   : > { %1272 = vst.msk [vmem:[#allocation2] sm:$0xff] %vm1271_vm5, %v1269_v7 }
 0xc9a   : > { %v1440_v8 = vpop.permute.xlu1 %1439 }
 0xc9b   : > { %1443 = vst.msk [vmem:[#allocation2] sm:$0xff] %vm1442_vm6, %v1440_v8 }
 0xc9c   : > { %1614 = vst.msk [vmem:[#allocation2] sm:$0xff] %vm1613_vm7, %v1611_v9  ;;  %v2585_v16 = vpop.eup %2584 }
 0xc9e   : > { %v1782_v10 = vpop.permute.xlu1 %1781 }
 0xc9f   : > { %1785 = vst.msk [vmem:[#allocation2] sm:$0xff] %vm1784_vm8, %v1782_v10 }
 0xcc4   : > { %v1945_v18 = vpop.f32.mrf.mxu1 }
 0xcc5   : > { %v1950_v56 = vmul.f32 %v2585_v16, %v1945_v18 }
 0xcc6   : > { %v2470_v14 = vpop.f32.mrf.mxu1 }
 0xcc7   : > { %1952 = vrot.lane.b32.xlu0 %v1950_v56, %s2650_s18  ;;  %s3224_s18 = scalar_lea.hbm %s3267_s8, %s2183_s17 }
 0xd39   : > { %v1953_v1 = vpop.permute.xlu0 %1952 }
 0xd3a   : > { %1956 = vst.msk [vmem:[#allocation2] sm:$0xff] %vm1955_vm9, %v1953_v1 }
 0xd41   : > { %v1957_v19 = vld [vmem:[#allocation2] sm:$0xff] }
 0xd42   : > { %2504 = vmatmul.mubr.f32.vlgmr.msra.gmra.mxu0 %v1957_v19 }
 0xe02   : > { %v2047_v2 = vpop.f32.mrf.mxu0 }
 0xe03   : > { %v2048_v21 = vadd.f32 %v2181_v20, %v2047_v2 }
 0xe04   : > { %v2505_v22 = vpop.f32.mrf.mxu0 }
 0xe05   : > { %2051 = vst [vmem:[%s322_s19] sm:$0xff] %v2048_v21 }
 0xe06   : > { %2599 = shalt.err (!%p2596_p3)
}
 0xe07   : > { %s2600_s12 = scalar_lea.hbm %s3224_s18, 128  ;;  %s2604_s17 = scalar_lea.hbm %s3267_s8, 256 }
 0xe08   : > { %p2601_p4 = scmp.ne.s32.totalorder %s3224_s18, %s2600_s12  ;;  %p2605_p9 = scmp.lt.s32.totalorder %s3224_s18, %s3267_s8 }
 0xe09   : > { %p2606_p10 = scmp.lt.s32.totalorder %s2604_s17, %s2600_s12 }
 0xe0a   : > { %p2602_p7 = pnand %p2601_p4, %p2741_p5 }
 0xe0b   : > { %p2607_p11 = por %p2606_p10, %p2605_p9 }
 0xe0c   : > { %p2603_p8 = pneg %p2602_p7 }
 0xe0e   : > { %p2608_p12 = pnand %p2607_p11, %p2603_p8 }
 0xe10   : > { %2611 = shalt.err (!%p2608_p12)
}
 0xe11   : > { %2506 = dma.vmem_to_hbm [thread:$0]  (%p2741_p5), %s2067_s20, 128, %s3224_s18, %s2053_s22  }
 0xe12 PF: > { %p2512_p13 = scmp.ge.s32.totalorder %s2646_s30, 2  ;;  %s2078_s23 = sand.u32 1, %s2634_s27  }
 0xe13   : > { %s2079_s25 = scalar_lea.sflag [#allocation4], %s2078_s23 }
 0xe14   : > { %p2509_p0 = pnand %p2512_p13, %p2745_p6 }
 0xe16   : > { %p2510_p1 = pneg %p2509_p0 }
 0xe18   : > { %2629 = dma.done.wait (%p2510_p1), %s2079_s25, 128  }
 0xe19   : > { %2631 = vsyncadd (%p2510_p1), %s2079_s25, 4294967168  ;;  %p18_p2 = scmp.ge.s32.totalorder %s2728_s11, 4   ;;  %s3270_s27 = smov %s2638_s28 }
 0xe1a   : > { %s3271_s28 = smov %s2642_s29  ;;  %s3272_s29 = smov %s2739_s14 }
 0xe1b   : > { %s3273_s30 = smov %s2728_s11  ;;  %20 = sbr.rel (!%p18_p2) target bundleno = 3 (0x3), region = 93 }
 0xe20   :  { %2084 = vsyncpa [#allocation4], 1 }
 0xe21   :  { %2086 = vsyncpa [#allocation4 + $0x1], 1 }

</bundles_post_ra>
